<compile_context>
chip_gen: v6e
topology: v6e:2x2x1
jax: 0.10.0
libtpu: 0.0.40
codegen_flags: <defaults>
</compile_context>

<pallas_src>
import re
from types import SimpleNamespace

import numpy as np
import jax
import jax.numpy as jnp
from jax import lax
from jax.experimental import pallas as pl
from jax.experimental.pallas import tpu as pltpu


# ---------------------------------------------------------------------------
# Pallas kernel (one grid step = one batch block; wavelength loop inside)
# ---------------------------------------------------------------------------
def _make_dip_kernel(mode, M, B, L):
    BM = B * M
    use_spread = (mode == "sum")

    def kernel(*refs):
        if use_spread:
            (kvec_ref, opd_ref, pup_ref, align_ref, gs_ref, gre_ref, gim_ref,
             bre_ref, bd_ref, bs_ref, spread_ref, out_ref, acc_ref) = refs
        else:
            (kvec_ref, opd_ref, pup_ref, align_ref, gs_ref, gre_ref, gim_ref,
             bre_ref, bd_ref, bs_ref, out_ref, acc_ref) = refs
            spread_ref = None

        opd = opd_ref[0]                              # [P, B*P] f32, batch in lanes

        def dotf(a, b):
            return jnp.dot(a, b, preferred_element_type=jnp.float32)

        acc_ref[...] = jnp.zeros_like(acc_ref)

        def one_wavelength(l):
            # Pupil-plane complex field for wavelength l (batch folded into lanes)
            k = kvec_ref[l]                           # 2*pi*1e-9 / lambda
            phase = k * opd + align_ref[l]            # OPD phase + center aligner
            pup = pup_ref[l]                          # sqrt(photons)*pupil (tiled)
            e_re = (pup * jnp.cos(phase)).astype(jnp.bfloat16)
            e_im = (pup * jnp.sin(phase)).astype(jnp.bfloat16)

            # Stage 1:  T = G @ E   (complex, Karatsuba; GS = Gre+Gim precomputed)
            m1 = dotf(gs_ref[l], e_re)
            m2 = dotf(gre_ref[l], e_im - e_re)
            m3 = dotf(gim_ref[l], e_re + e_im)
            t_re = (m1 - m3).astype(jnp.bfloat16)     # [M, B*P]
            t_im = (m1 + m2).astype(jnp.bfloat16)

            # Stage 2:  Y = T @ blockdiag(G^T / phi)   (complex, Karatsuba)
            n1 = dotf(t_re + t_im, bre_ref[l])
            n2 = dotf(t_re, bd_ref[l])                # bd = B_im - B_re
            n3 = dotf(t_im, bs_ref[l])                # bs = B_re + B_im
            y_re = n1 - n3                            # [M, B*M]
            y_im = n1 + n2
            acc_ref[...] += y_re * y_re + y_im * y_im # PSF accumulation over wavelengths

        if L <= 8:
            for l in range(L):                        # static unroll, static const idx
                one_wavelength(l)
        else:
            lax.fori_loop(0, L, lambda l, c: (one_wavelength(l), c)[1], 0)

        a = acc_ref[...]
        # Fused normalization (per batch element: M contiguous lanes each).
        # No epsilon guard, matching the PyTorch reference (padded rows give a
        # nonzero diffraction PSF, so no div-by-zero arises from batch padding).
        if mode == "sum":
            col = jnp.sum(a, axis=0, keepdims=True)                     # [1, B*M]
            den = dotf(col, spread_ref[...])                            # per-elem sums
            out_ref[0] = a * pl.reciprocal(den, approx=True)
        elif mode == "max":
            row = jnp.max(a, axis=0, keepdims=True)                     # [1, B*M]
            lane = lax.broadcasted_iota(jnp.int32, (1, BM), 1)
            den = jnp.ones((1, BM), jnp.float32)
            for b in range(B):                                          # tiny row maxes
                sel = (lane >= b * M) & (lane < (b + 1) * M)
                g = jnp.max(jnp.where(sel, row, -jnp.inf))
                den = jnp.where(sel, g, den)
            out_ref[0] = a * pl.reciprocal(den, approx=True)
        else:
            out_ref[0] = a

    return kernel


# ---------------------------------------------------------------------------
# DIP wrapper (constants precomputed host-side with numpy)
# ---------------------------------------------------------------------------
class DIPPallas:
    def __init__(self, tel, norm_mode):
        self.oversampling = 1
        self.norm_mode = norm_mode
        self.img_size = int(tel.img_resolution)
        self.tel = tel

        pupil = np.asarray(tel.pupil, np.float64)
        self.P = int(pupil.shape[0])

        flux = np.array([p["flux"] for p in tel.src.spectrum], np.float64)
        lams = np.array([p["wavelength"] for p in tel.src.spectrum], np.float64)
        self.L = len(lams)

        pixels_lam_D = tel.f / tel.det.pixel_size * lams / tel.D
        # matches reference: with initial oversampling==1 this stays 1
        self.oversampling = self.oversampling + int(
            self.oversampling % 2 != self.img_size % 2) * int(self.oversampling != 1)
        pad = np.round((self.oversampling * pixels_lam_D - 1) * self.P / 2).astype(int)
        self.phi_size = self.P + 2 * pad
        photons = (flux / pupil.sum() * tel.pupilReflectivity * tel.area
                   * tel.det.sampling_time)

        self.M = self.img_size * self.oversampling
        s = 1 - self.img_size % 2

        # Per-wavelength host-side constants (float64; cast when packed)
        self.wl = []
        for i in range(self.L):
            phi = int(self.phi_size[i])
            pd = int(pad[i])
            a = np.arange(self.P, dtype=np.float64) + pd            # padded pupil coords
            align = -(np.pi / phi) * s * (a[:, None] + a[None, :])  # center aligner phase
            u = (np.arange(self.M) - self.M // 2) % phi              # cropped/shifted freqs
            ang = -2.0 * np.pi * u[:, None].astype(np.float64) * a[None, :] / phi
            self.wl.append(dict(
                k=2.0 * np.pi * 1e-9 / lams[i],
                phi=float(phi),
                pupamp=np.sqrt(photons[i]) * pupil,                  # amp folded into pupil
                align=align,
                g_re=np.cos(ang),
                g_im=np.sin(ang)))
        self._cache = {}

    # -- hardware introspection --------------------------------------------------------
    @staticmethod
    def _tpu_generation():
        try:
            kind = jax.devices()[0].device_kind.lower()
            m = re.search(r"(\d+)", kind)
            return int(m.group(1)) if m else None
        except Exception:
            return None

    def _vmem_physical(self):
        try:
            return int(pltpu.get_tpu_info().vmem_capacity_bytes)
        except Exception:
            gen = self._tpu_generation()
            return (64 << 20) if (gen is not None and gen >= 7) else (128 << 20)

    def _vmem_footprint_bytes(self, B):
        P, M, L = self.P, self.M, self.L
        BP, BM = B * P, B * M
        const = L * (2 * P * BP * 4            # pupil*amp + aligner (f32)
                     + 3 * M * P * 2           # gs/gre/gim (bf16)
                     + 3 * BP * BM * 2)        # block-diag bre/bd/bs (bf16)
        io = 2 * 2 * (P * BP + M * BM) * 4     # double-buffered OPD in + PSF out (f32)
        return const + io + BM * BM * 4        # + sum-spread matrix

    # -- batch-block size: generation-aware ---------------------------------------------
    def _choose_B(self, N, M):
        gen = self._tpu_generation()
        multi_tc = gen is not None and gen >= 7          # v7x: 2 TensorCores / chip
        lane_budget = 256 if multi_tc else (512 if gen == 6 else 256)
        align = 128 // M if (M < 128 and 128 % M == 0) else 1
        b = max(1, lane_budget // max(M, 1))
        # Cap by resident-constant VMEM budget (block-diag matrices grow ~B^2).
        budget = (self._vmem_physical() * 3) // 5
        while b > 1 and self._vmem_footprint_bytes(b) > budget:
            b -= 1
        # Prefer lane-dense output blocks: B*M a multiple of 128.
        if align > 1 and b >= align:
            b -= b % align
        # Don't pad the batch far beyond N (padded rows are wasted compute).
        cap = -(-max(N, 1) // align) * align
        b = max(1, min(b, cap))
        # v7x only: keep >=2 parallel grid blocks so both TensorCores have work.
        if multi_tc:
            while b > 1 and -(-N // b) < 2:
                b = max(1, b // 2)
        return b

    # -- stacked / tiled constants for a given batch-block size B ----------------------
    def _constants_for_B(self, B):
        if B in self._cache:
            return self._cache[B]
        P, M, L = self.P, self.M, self.L
        BP, BM = B * P, B * M
        kvec = np.zeros((L,), np.float32)
        pup_t = np.zeros((L, P, BP), np.float32)
        align_t = np.zeros((L, P, BP), np.float32)
        gs = np.zeros((L, M, P), np.float64)
        gre = np.zeros((L, M, P), np.float64)
        gim = np.zeros((L, M, P), np.float64)
        bre = np.zeros((L, BP, BM), np.float64)
        bd = np.zeros((L, BP, BM), np.float64)
        bs = np.zeros((L, BP, BM), np.float64)
        eyeB = np.eye(B)
        for i, w in enumerate(self.wl):
            kvec[i] = w["k"]
            pup_t[i] = np.tile(w["pupamp"], (1, B))
            align_t[i] = np.tile(w["align"], (1, B))
            g_re, g_im = w["g_re"], w["g_im"]
            gs[i], gre[i], gim[i] = g_re + g_im, g_re, g_im
            gt_re = g_re.T / w["phi"]                  # 1/phi folded in
            gt_im = g_im.T / w["phi"]
            bre[i] = np.kron(eyeB, gt_re)              # block-diag over the batch block
            bd[i] = np.kron(eyeB, gt_im - gt_re)
            bs[i] = np.kron(eyeB, gt_re + gt_im)
        spread = np.kron(eyeB, np.ones((M, M), np.float32)).astype(np.float32)
        bf = jnp.bfloat16
        consts = (jnp.asarray(kvec),
                  jnp.asarray(pup_t), jnp.asarray(align_t),
                  jnp.asarray(gs, dtype=bf), jnp.asarray(gre, dtype=bf),
                  jnp.asarray(gim, dtype=bf),
                  jnp.asarray(bre, dtype=bf), jnp.asarray(bd, dtype=bf),
                  jnp.asarray(bs, dtype=bf),
                  jnp.asarray(spread))
        self._cache[B] = consts
        return consts

    def __call__(self, OPD):
        OPD = jnp.asarray(OPD, jnp.float32)
        if OPD.ndim == 2:
            OPD = OPD[None]
        N = OPD.shape[0]
        P, M, L = self.P, self.M, self.L

        B = self._choose_B(N, M)
        NB = -(-N // B)
        Npad = NB * B
        BP, BM = B * P, B * M
        if Npad != N:
            OPD = jnp.concatenate(
                [OPD, jnp.zeros((Npad - N, P, P), jnp.float32)], axis=0)

        # Fold the batch block into the lane dim: opd4[n, p, b*P + q] = OPD[n*B+b, p, q]
        opd4 = OPD.reshape(NB, B, P, P).transpose(0, 2, 1, 3).reshape(NB, P, BP)

        (kvec, pup_t, align_t, gs, gre, gim, bre, bd, bs,
         spread) = self._constants_for_B(B)
        kernel = _make_dip_kernel(self.norm_mode, M, B, L)

        def const_spec(shape):
            zeros = (0,) * len(shape)
            return pl.BlockSpec(shape, lambda n: zeros)   # same block every step: resident

        in_specs = [
            pl.BlockSpec(memory_space=pltpu.MemorySpace.SMEM),        # kvec [L]
            pl.BlockSpec((1, P, BP), lambda n: (n, 0, 0)),            # OPD block
            const_spec((L, P, BP)),                                   # pupil*amp (tiled)
            const_spec((L, P, BP)),                                   # aligner (tiled)
            const_spec((L, M, P)),                                    # Gre+Gim
            const_spec((L, M, P)),                                    # Gre
            const_spec((L, M, P)),                                    # Gim
            const_spec((L, BP, BM)),                                  # BD(Gt_re)
            const_spec((L, BP, BM)),                                  # BD(Gt_im-re)
            const_spec((L, BP, BM)),                                  # BD(Gt_re+im)
        ]
        args = [kvec, opd4, pup_t, align_t, gs, gre, gim, bre, bd, bs]
        if self.norm_mode == "sum":
            in_specs.append(const_spec((BM, BM)))                     # sum-spread matrix
            args.append(spread)

        footprint = self._vmem_footprint_bytes(B)
        vmem_limit = int(min(self._vmem_physical() * 3 // 4,
                             max(32 << 20, 2 * footprint + (4 << 20))))

        out3 = pl.pallas_call(
            kernel,
            out_shape=jax.ShapeDtypeStruct((NB, M, BM), jnp.float32),
            grid=(NB,),
            in_specs=in_specs,
            out_specs=pl.BlockSpec((1, M, BM), lambda n: (n, 0, 0)),
            scratch_shapes=[pltpu.VMEM((M, BM), jnp.float32)],
            compiler_params=pltpu.CompilerParams(
                dimension_semantics=("parallel",),
                vmem_limit_bytes=vmem_limit),
        )(*args)

        # Un-fold batch from lanes: [NB, M, B*M] -> [Npad, M, M] -> [:N]
        psf = (out3.reshape(NB, M, B, M).transpose(0, 2, 1, 3)
               .reshape(Npad, M, M))[:N]
        # binning: self.oversampling == 1 always in this module -> identity
        # TODO(synk): optional `obj` grouped-conv3d path not implemented (forward uses obj=None).
        return psf


# ---------------------------------------------------------------------------
# Pure-numpy reference mirroring the PyTorch forward (for validation)
# ---------------------------------------------------------------------------
def reference_forward(model, OPD_np):
    img = model.img_size
    P = model.P
    N = OPD_np.shape[0]
    pupil = np.asarray(model.tel.pupil, np.float64)
    flux = np.array([p["flux"] for p in model.tel.src.spectrum], np.float64)
    lams = np.array([p["wavelength"] for p in model.tel.src.spectrum], np.float64)
    photons = (flux / pupil.sum() * model.tel.pupilReflectivity * model.tel.area
               * model.tel.det.sampling_time)
    psf = np.zeros((N, img, img), np.float64)
    for i, lam in enumerate(lams):
        phi = int(model.phi_size[i])
        pd = (phi - P) // 2
        amp = np.sqrt(photons[i]) * pupil
        E = amp[None] * np.exp(2j * np.pi / lam * OPD_np * 1e-9)
        EMF = np.zeros((N, phi, phi), np.complex128)
        EMF[:, pd:pd + P, pd:pd + P] = E
        lin = np.arange(phi, dtype=np.float64)
        xx, yy = np.meshgrid(lin, lin, indexing="xy")
        aligner = np.exp(-1j * np.pi / phi * (xx + yy) * (1 - img % 2))
        Y = np.fft.fftshift(np.fft.fft2(EMF * aligner, axes=(-2, -1)) / phi,
                            axes=(-2, -1))
        full = np.abs(Y) ** 2
        c0 = phi // 2 - img * model.oversampling // 2
        c1 = phi // 2 + round((img * model.oversampling + 1e-6) / 2)
        psf += full[:, c0:c1, c0:c1]
    if model.norm_mode == "sum":
        return psf / psf.sum(axis=(1, 2), keepdims=True)
    elif model.norm_mode == "max":
        return psf / psf.max(axis=(1, 2), keepdims=True)
    return psf


# ---------------------------------------------------------------------------
if __name__ == "__main__":
    # Synthetic telescope (deterministic, in-script)
    P = 16          # pupil resolution
    IMG = 16        # detector image resolution
    yy, xx = np.mgrid[0:P, 0:P]
    r = np.sqrt((xx - (P - 1) / 2.0) ** 2 + (yy - (P - 1) / 2.0) ** 2)
    pupil = (r <= P / 2.0 - 0.5).astype(np.float64)

    tel = SimpleNamespace(
        img_resolution=IMG,
        pupil=pupil,
        D=8.0,
        f=200.0,
        pupilReflectivity=1.0,
        area=np.pi * (8.0 / 2.0) ** 2,
        det=SimpleNamespace(pixel_size=6.25e-6, sampling_time=1e-3),
        src=SimpleNamespace(spectrum=[
            {"flux": 1.0e9, "wavelength": 500e-9},   # -> phi = 32
            {"flux": 0.8e9, "wavelength": 625e-9},   # -> phi = 40
        ]),
    )

    key = jax.random.PRNGKey(0)

    # --- test 1: sum-normalization, N=3 (exercises batch blocking + padding) ----------
    model_sum = DIPPallas(tel, norm_mode="sum")
    OPD3 = 50.0 * jax.random.normal(key, (3, P, P), dtype=jnp.float32)
    out_sum = jax.block_until_ready(model_sum(OPD3))
    ref_sum = reference_forward(model_sum, np.asarray(OPD3, np.float64))
    assert out_sum.shape == ref_sum.shape
    assert np.allclose(np.asarray(out_sum, np.float64), ref_sum,
                       rtol=1e-1, atol=1e-3 * ref_sum.max()), (
        "sum-mode max abs err = %g" % np.max(np.abs(np.asarray(out_sum) - ref_sum)))

    # --- test 2: max-normalization, N=2 -----------------------------------------------
    model_max = DIPPallas(tel, norm_mode="max")
    OPD2 = 50.0 * jax.random.normal(jax.random.PRNGKey(1), (2, P, P), dtype=jnp.float32)
    out_max = jax.block_until_ready(model_max(OPD2))
    ref_max = reference_forward(model_max, np.asarray(OPD2, np.float64))
    assert out_max.shape == ref_max.shape
    assert np.allclose(np.asarray(out_max, np.float64), ref_max,
                       rtol=1e-1, atol=1e-3 * ref_max.max()), (
        "max-mode max abs err = %g" % np.max(np.abs(np.asarray(out_max) - ref_max)))

    print("KERNEL_OK")
</pallas_src>

<mosaic_0001>
module attributes {stable_mosaic.version = 11 : i64} {
  func.func @kernel(%arg0: i32, %arg1: memref<2xf32, #tpu.memory_space<smem>>, %arg2: memref<1x16x128xf32, #tpu.memory_space<vmem>>, %arg3: memref<2x16x128xf32, #tpu.memory_space<vmem>>, %arg4: memref<2x16x128xf32, #tpu.memory_space<vmem>>, %arg5: memref<2x16x16xbf16, #tpu.memory_space<vmem>>, %arg6: memref<2x16x16xbf16, #tpu.memory_space<vmem>>, %arg7: memref<2x16x16xbf16, #tpu.memory_space<vmem>>, %arg8: memref<2x128x128xbf16, #tpu.memory_space<vmem>>, %arg9: memref<2x128x128xbf16, #tpu.memory_space<vmem>>, %arg10: memref<2x128x128xbf16, #tpu.memory_space<vmem>>, %arg11: memref<128x128xf32, #tpu.memory_space<vmem>>, %arg12: memref<1x16x128xf32, #tpu.memory_space<vmem>>, %arg13: memref<16x128xf32, #tpu.memory_space<vmem>>) attributes {dimension_semantics = [#tpu.dimension_semantics<parallel>], iteration_bounds = array<i64: 1>, scalar_prefetch = 0 : i64, scratch_operands = 1 : i64, tpu.core_type = #tpu.core_type<tc>, window_params = [{transform_indices = @transform_0, window_bounds = array<i64: 2>}, {transform_indices = @transform_1, window_bounds = array<i64: 1, 16, 128>}, {pipeline_mode = #tpu.pipeline_mode<synchronous>, transform_indices = @transform_2, window_bounds = array<i64: 2, 16, 128>}, {pipeline_mode = #tpu.pipeline_mode<synchronous>, transform_indices = @transform_3, window_bounds = array<i64: 2, 16, 128>}, {pipeline_mode = #tpu.pipeline_mode<synchronous>, transform_indices = @transform_4, window_bounds = array<i64: 2, 16, 16>}, {pipeline_mode = #tpu.pipeline_mode<synchronous>, transform_indices = @transform_5, window_bounds = array<i64: 2, 16, 16>}, {pipeline_mode = #tpu.pipeline_mode<synchronous>, transform_indices = @transform_6, window_bounds = array<i64: 2, 16, 16>}, {pipeline_mode = #tpu.pipeline_mode<synchronous>, transform_indices = @transform_7, window_bounds = array<i64: 2, 128, 128>}, {pipeline_mode = #tpu.pipeline_mode<synchronous>, transform_indices = @transform_8, window_bounds = array<i64: 2, 128, 128>}, {pipeline_mode = #tpu.pipeline_mode<synchronous>, transform_indices = @transform_9, window_bounds = array<i64: 2, 128, 128>}, {pipeline_mode = #tpu.pipeline_mode<synchronous>, transform_indices = @transform_10, window_bounds = array<i64: 128, 128>}, {transform_indices = @transform_11, window_bounds = array<i64: 1, 16, 128>}]} {
    %c0 = arith.constant 0 : index
    %c0_0 = arith.constant 0 : index
    %c0_1 = arith.constant 0 : index
    %0 = vector.load %arg2[%c0, %c0_0, %c0_1] : memref<1x16x128xf32, #tpu.memory_space<vmem>>, vector<1x16x128xf32>
    %1 = vector.shape_cast %0 : vector<1x16x128xf32> to vector<16x128xf32>
    %cst = arith.constant 0.000000e+00 : f32
    %2 = vector.broadcast %cst : f32 to vector<16x128xf32>
    %c0_2 = arith.constant 0 : index
    %c0_3 = arith.constant 0 : index
    %3 = vector.load %arg13[%c0_2, %c0_3] : memref<16x128xf32, #tpu.memory_space<vmem>>, vector<16x128xf32>
    tpu.vector_store %arg13[%c0_2, %c0_3], %2 {strides = array<i32>} : memref<16x128xf32, #tpu.memory_space<vmem>>, vector<16x128xf32>,
    %c0_4 = arith.constant 0 : index
    %4 = memref.load %arg1[%c0_4] : memref<2xf32, #tpu.memory_space<smem>>
    %5 = vector.broadcast %4 : f32 to vector<16x128xf32>
    %6 = arith.mulf %5, %1 : vector<16x128xf32>
    %c0_5 = arith.constant 0 : index
    %c0_6 = arith.constant 0 : index
    %c0_7 = arith.constant 0 : index
    %7 = vector.load %arg4[%c0_5, %c0_6, %c0_7] : memref<2x16x128xf32, #tpu.memory_space<vmem>>, vector<1x16x128xf32>
    %8 = vector.shape_cast %7 : vector<1x16x128xf32> to vector<16x128xf32>
    %9 = arith.addf %6, %8 : vector<16x128xf32>
    %c0_8 = arith.constant 0 : index
    %c0_9 = arith.constant 0 : index
    %c0_10 = arith.constant 0 : index
    %10 = vector.load %arg3[%c0_8, %c0_9, %c0_10] : memref<2x16x128xf32, #tpu.memory_space<vmem>>, vector<1x16x128xf32>
    %11 = vector.shape_cast %10 : vector<1x16x128xf32> to vector<16x128xf32>
    %12 = math.cos %9 : vector<16x128xf32>
    %13 = arith.mulf %11, %12 : vector<16x128xf32>
    %14 = arith.truncf %13 : vector<16x128xf32> to vector<16x128xbf16>
    %15 = math.sin %9 : vector<16x128xf32>
    %16 = arith.mulf %11, %15 : vector<16x128xf32>
    %17 = arith.truncf %16 : vector<16x128xf32> to vector<16x128xbf16>
    %c0_11 = arith.constant 0 : index
    %c0_12 = arith.constant 0 : index
    %c0_13 = arith.constant 0 : index
    %18 = vector.load %arg5[%c0_11, %c0_12, %c0_13] : memref<2x16x16xbf16, #tpu.memory_space<vmem>>, vector<1x16x16xbf16>
    %19 = vector.shape_cast %18 : vector<1x16x16xbf16> to vector<16x16xbf16>
    %cst_14 = arith.constant dense<0.000000e+00> : vector<16x128xf32>
    %20 = tpu.matmul %19, %14, %cst_14 {dimension_numbers = #tpu.dot_dimension_numbers<[1], [0], [0], [1], [0, 0, 1, 1], [], []>} : vector<16x16xbf16>, vector<16x128xbf16>, vector<16x128xf32> -> vector<16x128xf32>
    %c0_15 = arith.constant 0 : index
    %c0_16 = arith.constant 0 : index
    %c0_17 = arith.constant 0 : index
    %21 = vector.load %arg6[%c0_15, %c0_16, %c0_17] : memref<2x16x16xbf16, #tpu.memory_space<vmem>>, vector<1x16x16xbf16>
    %22 = vector.shape_cast %21 : vector<1x16x16xbf16> to vector<16x16xbf16>
    %23 = arith.subf %17, %14 : vector<16x128xbf16>
    %cst_18 = arith.constant dense<0.000000e+00> : vector<16x128xf32>
    %24 = tpu.matmul %22, %23, %cst_18 {dimension_numbers = #tpu.dot_dimension_numbers<[1], [0], [0], [1], [0, 0, 1, 1], [], []>} : vector<16x16xbf16>, vector<16x128xbf16>, vector<16x128xf32> -> vector<16x128xf32>
    %c0_19 = arith.constant 0 : index
    %c0_20 = arith.constant 0 : index
    %c0_21 = arith.constant 0 : index
    %25 = vector.load %arg7[%c0_19, %c0_20, %c0_21] : memref<2x16x16xbf16, #tpu.memory_space<vmem>>, vector<1x16x16xbf16>
    %26 = vector.shape_cast %25 : vector<1x16x16xbf16> to vector<16x16xbf16>
    %27 = arith.addf %14, %17 : vector<16x128xbf16>
    %cst_22 = arith.constant dense<0.000000e+00> : vector<16x128xf32>
    %28 = tpu.matmul %26, %27, %cst_22 {dimension_numbers = #tpu.dot_dimension_numbers<[1], [0], [0], [1], [0, 0, 1, 1], [], []>} : vector<16x16xbf16>, vector<16x128xbf16>, vector<16x128xf32> -> vector<16x128xf32>
    %29 = arith.subf %20, %28 : vector<16x128xf32>
    %30 = arith.truncf %29 : vector<16x128xf32> to vector<16x128xbf16>
    %31 = arith.addf %20, %24 : vector<16x128xf32>
    %32 = arith.truncf %31 : vector<16x128xf32> to vector<16x128xbf16>
    %33 = arith.addf %30, %32 : vector<16x128xbf16>
    %c0_23 = arith.constant 0 : index
    %c0_24 = arith.constant 0 : index
    %c0_25 = arith.constant 0 : index
    %34 = vector.load %arg8[%c0_23, %c0_24, %c0_25] : memref<2x128x128xbf16, #tpu.memory_space<vmem>>, vector<1x128x128xbf16>
    %35 = vector.shape_cast %34 : vector<1x128x128xbf16> to vector<128x128xbf16>
    %cst_26 = arith.constant dense<0.000000e+00> : vector<16x128xf32>
    %36 = tpu.matmul %33, %35, %cst_26 {dimension_numbers = #tpu.dot_dimension_numbers<[1], [0], [0], [1], [0, 0, 1, 1], [], []>} : vector<16x128xbf16>, vector<128x128xbf16>, vector<16x128xf32> -> vector<16x128xf32>
    %c0_27 = arith.constant 0 : index
    %c0_28 = arith.constant 0 : index
    %c0_29 = arith.constant 0 : index
    %37 = vector.load %arg9[%c0_27, %c0_28, %c0_29] : memref<2x128x128xbf16, #tpu.memory_space<vmem>>, vector<1x128x128xbf16>
    %38 = vector.shape_cast %37 : vector<1x128x128xbf16> to vector<128x128xbf16>
    %cst_30 = arith.constant dense<0.000000e+00> : vector<16x128xf32>
    %39 = tpu.matmul %30, %38, %cst_30 {dimension_numbers = #tpu.dot_dimension_numbers<[1], [0], [0], [1], [0, 0, 1, 1], [], []>} : vector<16x128xbf16>, vector<128x128xbf16>, vector<16x128xf32> -> vector<16x128xf32>
    %c0_31 = arith.constant 0 : index
    %c0_32 = arith.constant 0 : index
    %c0_33 = arith.constant 0 : index
    %40 = vector.load %arg10[%c0_31, %c0_32, %c0_33] : memref<2x128x128xbf16, #tpu.memory_space<vmem>>, vector<1x128x128xbf16>
    %41 = vector.shape_cast %40 : vector<1x128x128xbf16> to vector<128x128xbf16>
    %cst_34 = arith.constant dense<0.000000e+00> : vector<16x128xf32>
    %42 = tpu.matmul %32, %41, %cst_34 {dimension_numbers = #tpu.dot_dimension_numbers<[1], [0], [0], [1], [0, 0, 1, 1], [], []>} : vector<16x128xbf16>, vector<128x128xbf16>, vector<16x128xf32> -> vector<16x128xf32>
    %43 = arith.subf %36, %42 : vector<16x128xf32>
    %44 = arith.addf %36, %39 : vector<16x128xf32>
    %c0_35 = arith.constant 0 : index
    %c0_36 = arith.constant 0 : index
    %45 = vector.load %arg13[%c0_35, %c0_36] : memref<16x128xf32, #tpu.memory_space<vmem>>, vector<16x128xf32>
    %46 = arith.mulf %43, %43 : vector<16x128xf32>
    %47 = arith.mulf %44, %44 : vector<16x128xf32>
    %48 = arith.addf %46, %47 : vector<16x128xf32>
    %49 = arith.addf %45, %48 : vector<16x128xf32>
    %c0_37 = arith.constant 0 : index
    %c0_38 = arith.constant 0 : index
    %50 = vector.load %arg13[%c0_37, %c0_38] : memref<16x128xf32, #tpu.memory_space<vmem>>, vector<16x128xf32>
    tpu.vector_store %arg13[%c0_37, %c0_38], %49 {strides = array<i32>} : memref<16x128xf32, #tpu.memory_space<vmem>>, vector<16x128xf32>,
    %c1 = arith.constant 1 : index
    %51 = memref.load %arg1[%c1] : memref<2xf32, #tpu.memory_space<smem>>
    %52 = vector.broadcast %51 : f32 to vector<16x128xf32>
    %53 = arith.mulf %52, %1 : vector<16x128xf32>
    %c1_39 = arith.constant 1 : index
    %c0_40 = arith.constant 0 : index
    %c0_41 = arith.constant 0 : index
    %54 = vector.load %arg4[%c1_39, %c0_40, %c0_41] : memref<2x16x128xf32, #tpu.memory_space<vmem>>, vector<1x16x128xf32>
    %55 = vector.shape_cast %54 : vector<1x16x128xf32> to vector<16x128xf32>
    %56 = arith.addf %53, %55 : vector<16x128xf32>
    %c1_42 = arith.constant 1 : index
    %c0_43 = arith.constant 0 : index
    %c0_44 = arith.constant 0 : index
    %57 = vector.load %arg3[%c1_42, %c0_43, %c0_44] : memref<2x16x128xf32, #tpu.memory_space<vmem>>, vector<1x16x128xf32>
    %58 = vector.shape_cast %57 : vector<1x16x128xf32> to vector<16x128xf32>
    %59 = math.cos %56 : vector<16x128xf32>
    %60 = arith.mulf %58, %59 : vector<16x128xf32>
    %61 = arith.truncf %60 : vector<16x128xf32> to vector<16x128xbf16>
    %62 = math.sin %56 : vector<16x128xf32>
    %63 = arith.mulf %58, %62 : vector<16x128xf32>
    %64 = arith.truncf %63 : vector<16x128xf32> to vector<16x128xbf16>
    %c1_45 = arith.constant 1 : index
    %c0_46 = arith.constant 0 : index
    %c0_47 = arith.constant 0 : index
    %65 = vector.load %arg5[%c1_45, %c0_46, %c0_47] : memref<2x16x16xbf16, #tpu.memory_space<vmem>>, vector<1x16x16xbf16>
    %66 = vector.shape_cast %65 : vector<1x16x16xbf16> to vector<16x16xbf16>
    %cst_48 = arith.constant dense<0.000000e+00> : vector<16x128xf32>
    %67 = tpu.matmul %66, %61, %cst_48 {dimension_numbers = #tpu.dot_dimension_numbers<[1], [0], [0], [1], [0, 0, 1, 1], [], []>} : vector<16x16xbf16>, vector<16x128xbf16>, vector<16x128xf32> -> vector<16x128xf32>
    %c1_49 = arith.constant 1 : index
    %c0_50 = arith.constant 0 : index
    %c0_51 = arith.constant 0 : index
    %68 = vector.load %arg6[%c1_49, %c0_50, %c0_51] : memref<2x16x16xbf16, #tpu.memory_space<vmem>>, vector<1x16x16xbf16>
    %69 = vector.shape_cast %68 : vector<1x16x16xbf16> to vector<16x16xbf16>
    %70 = arith.subf %64, %61 : vector<16x128xbf16>
    %cst_52 = arith.constant dense<0.000000e+00> : vector<16x128xf32>
    %71 = tpu.matmul %69, %70, %cst_52 {dimension_numbers = #tpu.dot_dimension_numbers<[1], [0], [0], [1], [0, 0, 1, 1], [], []>} : vector<16x16xbf16>, vector<16x128xbf16>, vector<16x128xf32> -> vector<16x128xf32>
    %c1_53 = arith.constant 1 : index
    %c0_54 = arith.constant 0 : index
    %c0_55 = arith.constant 0 : index
    %72 = vector.load %arg7[%c1_53, %c0_54, %c0_55] : memref<2x16x16xbf16, #tpu.memory_space<vmem>>, vector<1x16x16xbf16>
    %73 = vector.shape_cast %72 : vector<1x16x16xbf16> to vector<16x16xbf16>
    %74 = arith.addf %61, %64 : vector<16x128xbf16>
    %cst_56 = arith.constant dense<0.000000e+00> : vector<16x128xf32>
    %75 = tpu.matmul %73, %74, %cst_56 {dimension_numbers = #tpu.dot_dimension_numbers<[1], [0], [0], [1], [0, 0, 1, 1], [], []>} : vector<16x16xbf16>, vector<16x128xbf16>, vector<16x128xf32> -> vector<16x128xf32>
    %76 = arith.subf %67, %75 : vector<16x128xf32>
    %77 = arith.truncf %76 : vector<16x128xf32> to vector<16x128xbf16>
    %78 = arith.addf %67, %71 : vector<16x128xf32>
    %79 = arith.truncf %78 : vector<16x128xf32> to vector<16x128xbf16>
    %80 = arith.addf %77, %79 : vector<16x128xbf16>
    %c1_57 = arith.constant 1 : index
    %c0_58 = arith.constant 0 : index
    %c0_59 = arith.constant 0 : index
    %81 = vector.load %arg8[%c1_57, %c0_58, %c0_59] : memref<2x128x128xbf16, #tpu.memory_space<vmem>>, vector<1x128x128xbf16>
    %82 = vector.shape_cast %81 : vector<1x128x128xbf16> to vector<128x128xbf16>
    %cst_60 = arith.constant dense<0.000000e+00> : vector<16x128xf32>
    %83 = tpu.matmul %80, %82, %cst_60 {dimension_numbers = #tpu.dot_dimension_numbers<[1], [0], [0], [1], [0, 0, 1, 1], [], []>} : vector<16x128xbf16>, vector<128x128xbf16>, vector<16x128xf32> -> vector<16x128xf32>
    %c1_61 = arith.constant 1 : index
    %c0_62 = arith.constant 0 : index
    %c0_63 = arith.constant 0 : index
    %84 = vector.load %arg9[%c1_61, %c0_62, %c0_63] : memref<2x128x128xbf16, #tpu.memory_space<vmem>>, vector<1x128x128xbf16>
    %85 = vector.shape_cast %84 : vector<1x128x128xbf16> to vector<128x128xbf16>
    %cst_64 = arith.constant dense<0.000000e+00> : vector<16x128xf32>
    %86 = tpu.matmul %77, %85, %cst_64 {dimension_numbers = #tpu.dot_dimension_numbers<[1], [0], [0], [1], [0, 0, 1, 1], [], []>} : vector<16x128xbf16>, vector<128x128xbf16>, vector<16x128xf32> -> vector<16x128xf32>
    %c1_65 = arith.constant 1 : index
    %c0_66 = arith.constant 0 : index
    %c0_67 = arith.constant 0 : index
    %87 = vector.load %arg10[%c1_65, %c0_66, %c0_67] : memref<2x128x128xbf16, #tpu.memory_space<vmem>>, vector<1x128x128xbf16>
    %88 = vector.shape_cast %87 : vector<1x128x128xbf16> to vector<128x128xbf16>
    %cst_68 = arith.constant dense<0.000000e+00> : vector<16x128xf32>
    %89 = tpu.matmul %79, %88, %cst_68 {dimension_numbers = #tpu.dot_dimension_numbers<[1], [0], [0], [1], [0, 0, 1, 1], [], []>} : vector<16x128xbf16>, vector<128x128xbf16>, vector<16x128xf32> -> vector<16x128xf32>
    %90 = arith.subf %83, %89 : vector<16x128xf32>
    %91 = arith.addf %83, %86 : vector<16x128xf32>
    %c0_69 = arith.constant 0 : index
    %c0_70 = arith.constant 0 : index
    %92 = vector.load %arg13[%c0_69, %c0_70] : memref<16x128xf32, #tpu.memory_space<vmem>>, vector<16x128xf32>
    %93 = arith.mulf %90, %90 : vector<16x128xf32>
    %94 = arith.mulf %91, %91 : vector<16x128xf32>
    %95 = arith.addf %93, %94 : vector<16x128xf32>
    %96 = arith.addf %92, %95 : vector<16x128xf32>
    %c0_71 = arith.constant 0 : index
    %c0_72 = arith.constant 0 : index
    %97 = vector.load %arg13[%c0_71, %c0_72] : memref<16x128xf32, #tpu.memory_space<vmem>>, vector<16x128xf32>
    tpu.vector_store %arg13[%c0_71, %c0_72], %96 {strides = array<i32>} : memref<16x128xf32, #tpu.memory_space<vmem>>, vector<16x128xf32>,
    %c0_73 = arith.constant 0 : index
    %c0_74 = arith.constant 0 : index
    %98 = vector.load %arg13[%c0_73, %c0_74] : memref<16x128xf32, #tpu.memory_space<vmem>>, vector<16x128xf32>
    %cst_75 = arith.constant dense<0.000000e+00> : vector<128xf32>
    %99 = vector.multi_reduction <add>, %98, %cst_75 [0] : vector<16x128xf32> to vector<128xf32>
    %100 = vector.shape_cast %99 : vector<128xf32> to vector<1x128xf32>
    %c0_76 = arith.constant 0 : index
    %c0_77 = arith.constant 0 : index
    %101 = vector.load %arg11[%c0_76, %c0_77] : memref<128x128xf32, #tpu.memory_space<vmem>>, vector<128x128xf32>
    %cst_78 = arith.constant dense<0.000000e+00> : vector<1x128xf32>
    %102 = tpu.matmul %100, %101, %cst_78 {dimension_numbers = #tpu.dot_dimension_numbers<[1], [0], [0], [1], [0, 0, 1, 1], [], []>} : vector<1x128xf32>, vector<128x128xf32>, vector<1x128xf32> -> vector<1x128xf32>
    %103 = tpu.reciprocal %102 {approx = true} : vector<1x128xf32> -> vector<1x128xf32>
    %104 = vector.broadcast %103 : vector<1x128xf32> to vector<16x128xf32>
    %105 = arith.mulf %98, %104 : vector<16x128xf32>
    %c0_79 = arith.constant 0 : index
    %c0_80 = arith.constant 0 : index
    %c0_81 = arith.constant 0 : index
    %106 = vector.load %arg12[%c0_79, %c0_80, %c0_81] : memref<1x16x128xf32, #tpu.memory_space<vmem>>, vector<1x16x128xf32>
    %107 = vector.shape_cast %106 : vector<1x16x128xf32> to vector<16x128xf32>
    %108 = vector.shape_cast %105 : vector<16x128xf32> to vector<1x16x128xf32>
    tpu.vector_store %arg12[%c0_79, %c0_80, %c0_81], %108 {strides = array<i32>} : memref<1x16x128xf32, #tpu.memory_space<vmem>>, vector<1x16x128xf32>,
    return
  }
  func.func @transform_0(%arg0: i32) -> i32 {
    %c0_i32 = arith.constant 0 : i32
    %c0_i32_0 = arith.constant 0 : i32
    return %c0_i32 : i32
  }
  func.func @transform_1(%arg0: i32) -> (i32, i32, i32) {
    %c0_i32 = arith.constant 0 : i32
    %c0_i32_0 = arith.constant 0 : i32
    %c0_i32_1 = arith.constant 0 : i32
    return %arg0, %c0_i32, %c0_i32_0 : i32, i32, i32
  }
  func.func @transform_2(%arg0: i32) -> (i32, i32, i32) {
    %c0_i32 = arith.constant 0 : i32
    %c0_i32_0 = arith.constant 0 : i32
    %c0_i32_1 = arith.constant 0 : i32
    %c0_i32_2 = arith.constant 0 : i32
    return %c0_i32, %c0_i32_0, %c0_i32_1 : i32, i32, i32
  }
  func.func @transform_3(%arg0: i32) -> (i32, i32, i32) {
    %c0_i32 = arith.constant 0 : i32
    %c0_i32_0 = arith.constant 0 : i32
    %c0_i32_1 = arith.constant 0 : i32
    %c0_i32_2 = arith.constant 0 : i32
    return %c0_i32, %c0_i32_0, %c0_i32_1 : i32, i32, i32
  }
  func.func @transform_4(%arg0: i32) -> (i32, i32, i32) {
    %c0_i32 = arith.constant 0 : i32
    %c0_i32_0 = arith.constant 0 : i32
    %c0_i32_1 = arith.constant 0 : i32
    %c0_i32_2 = arith.constant 0 : i32
    return %c0_i32, %c0_i32_0, %c0_i32_1 : i32, i32, i32
  }
  func.func @transform_5(%arg0: i32) -> (i32, i32, i32) {
    %c0_i32 = arith.constant 0 : i32
    %c0_i32_0 = arith.constant 0 : i32
    %c0_i32_1 = arith.constant 0 : i32
    %c0_i32_2 = arith.constant 0 : i32
    return %c0_i32, %c0_i32_0, %c0_i32_1 : i32, i32, i32
  }
  func.func @transform_6(%arg0: i32) -> (i32, i32, i32) {
    %c0_i32 = arith.constant 0 : i32
    %c0_i32_0 = arith.constant 0 : i32
    %c0_i32_1 = arith.constant 0 : i32
    %c0_i32_2 = arith.constant 0 : i32
    return %c0_i32, %c0_i32_0, %c0_i32_1 : i32, i32, i32
  }
  func.func @transform_7(%arg0: i32) -> (i32, i32, i32) {
    %c0_i32 = arith.constant 0 : i32
    %c0_i32_0 = arith.constant 0 : i32
    %c0_i32_1 = arith.constant 0 : i32
    %c0_i32_2 = arith.constant 0 : i32
    return %c0_i32, %c0_i32_0, %c0_i32_1 : i32, i32, i32
  }
  func.func @transform_8(%arg0: i32) -> (i32, i32, i32) {
    %c0_i32 = arith.constant 0 : i32
    %c0_i32_0 = arith.constant 0 : i32
    %c0_i32_1 = arith.constant 0 : i32
    %c0_i32_2 = arith.constant 0 : i32
    return %c0_i32, %c0_i32_0, %c0_i32_1 : i32, i32, i32
  }
  func.func @transform_9(%arg0: i32) -> (i32, i32, i32) {
    %c0_i32 = arith.constant 0 : i32
    %c0_i32_0 = arith.constant 0 : i32
    %c0_i32_1 = arith.constant 0 : i32
    %c0_i32_2 = arith.constant 0 : i32
    return %c0_i32, %c0_i32_0, %c0_i32_1 : i32, i32, i32
  }
  func.func @transform_10(%arg0: i32) -> (i32, i32) {
    %c0_i32 = arith.constant 0 : i32
    %c0_i32_0 = arith.constant 0 : i32
    %c0_i32_1 = arith.constant 0 : i32
    return %c0_i32, %c0_i32_0 : i32, i32
  }
  func.func @transform_11(%arg0: i32) -> (i32, i32, i32) {
    %c0_i32 = arith.constant 0 : i32
    %c0_i32_0 = arith.constant 0 : i32
    %c0_i32_1 = arith.constant 0 : i32
    return %arg0, %c0_i32, %c0_i32_0 : i32, i32, i32
  }
}

</mosaic_0001>

<bundles_post_ra>
// kernel: tpu_custom_call.1
= control target key start
LH: loop header
LB: loop body
LE: loop exit
PB: predicated region body
PF: predicated region fallthrough
CT: control target
= control target key end

     0   :  { %16 = vsyncpa [#allocation6], 0  ;;  %s3418_s0 = inlined_call_operand.hbm [shape: f32[2], index: 0, kind: input, shape index: {}]   ;;  %s3419_s1 = inlined_call_operand.hbm [shape: f32[1,16,128], index: 1, kind: input, shape index: {}]   ;;  %s3420_s2 = inlined_call_operand.hbm [shape: f32[2,16,128], index: 2, kind: input, shape index: {}]   ;;  %s3421_s3 = inlined_call_operand.hbm [shape: f32[2,16,128], index: 3, kind: input, shape index: {}]   ;;  %s3422_s4 = inlined_call_operand.hbm [shape: bf16[2,16,16], index: 4, kind: input, shape index: {}]   ;;  %s3423_s5 = inlined_call_operand.hbm [shape: bf16[2,16,16], index: 5, kind: input, shape index: {}]   ;;  %s3424_s6 = inlined_call_operand.hbm [shape: bf16[2,16,16], index: 6, kind: input, shape index: {}]   ;;  %s3425_s7 = inlined_call_operand.hbm [shape: bf16[2,128,128], index: 7, kind: input, shape index: {}]   ;;  %s3426_s8 = inlined_call_operand.hbm [shape: bf16[2,128,128], index: 8, kind: input, shape index: {}]   ;;  %s3427_s9 = inlined_call_operand.hbm [shape: bf16[2,128,128], index: 9, kind: input, shape index: {}]   ;;  %s3428_s10 = inlined_call_operand.hbm [shape: f32[128,128], index: 10, kind: input, shape index: {}]   ;;  %s3429_s11 = inlined_call_operand.hbm [shape: f32[1,16,128], index: 11, kind: output, shape index: {}]  }
   0x1   :  { %17 = vsyncpa [#allocation4], 0 }
   0x2   :  { %18 = vsyncpa [#allocation9], 0 }
   0x3   :  { %19 = vsyncpa [#allocation12], 0 }
   0x4   :  { %20 = vsyncpa [#allocation15], 0 }
   0x5   :  { %21 = vsyncpa [#allocation18], 0 }
   0x6   :  { %22 = vsyncpa [#allocation21], 0 }
   0x7   :  { %23 = vsyncpa [#allocation5], 0  ;;  %s2896_s17 = smov [#allocation8]   ;;  %s2897_s19 = smov [#allocation11]  }
   0x8   :  { %s49_s18 = sshll.u32 %s2896_s17, 4  ;;  %s73_s20 = sshll.u32 %s2897_s19, 4  ;;  %s50_s18 = int_to_ptr.vmem [resolvable:$true] %s49_s18  ;;  %s74_s20 = int_to_ptr.vmem [resolvable:$true] %s73_s20 }
   0x9   :  { %s2660_s21 = scalar_lea.vmem %s50_s18, 512  ;;  %p2665_p1 = scmp.lt.s32.totalorder %s50_s18, %s50_s18 }
   0xa   :  { %p2661_p0 = scmp.ne.s32.totalorder %s50_s18, %s2660_s21  ;;  %p2666_p2 = scmp.lt.s32.totalorder %s2660_s21, %s2660_s21 }
   0xc   :  { %p2667_p3 = por %p2666_p2, %p2665_p1 }
   0xe   :  { %p2668_p4 = pnand %p2667_p3, %p2661_p0 }
  0x10   :  { %2671 = shalt.err (!%p2668_p4)
}
  0x11   :  { %s2898_s22 = smov 128   ;;  %s2899_s23 = smov 8  }
  0x12   :  { %55 = dma.hbm_to_vmem [thread:$0]  %s3420_s2, 512, %s50_s18, [#allocation9], %s2898_s22, %s2898_s22, %s2899_s23  }
  0x13   :  { %s2680_s26 = scalar_lea.vmem %s74_s20, 256  ;;  %p2685_p6 = scmp.lt.s32.totalorder %s74_s20, %s74_s20 }
  0x14   :  { %p2681_p5 = scmp.ne.s32.totalorder %s74_s20, %s2680_s26  ;;  %p2686_p7 = scmp.lt.s32.totalorder %s2680_s26, %s2680_s26 }
  0x16   :  { %p2687_p8 = por %p2686_p7, %p2685_p6 }
  0x18   :  { %p2688_p9 = pnand %p2687_p8, %p2681_p5 }
  0x1a   :  { %2691 = shalt.err (!%p2688_p9)
}
  0x1b   :  { %s2900_s27 = smov 64   ;;  %s2901_s28 = smov 4  }
  0x1c   :  { %79 = dma.hbm_to_vmem [thread:$0]  %s3422_s4, 256, %s74_s20, [#allocation12], %s2900_s27, %s2900_s27, %s2901_s28  }
  0x1d   :  { %s2902_s12 = smov [#allocation14]   ;;  %s2903_s14 = smov [#allocation17]  }
  0x1e   :  { %s97_s13 = sshll.u32 %s2902_s12, 4  ;;  %s121_s2 = sshll.u32 %s2903_s14, 4  ;;  %s98_s13 = int_to_ptr.vmem [resolvable:$true] %s97_s13  ;;  %s122_s2 = int_to_ptr.vmem [resolvable:$true] %s121_s2 }
  0x1f   :  { %s2700_s15 = scalar_lea.vmem %s98_s13, 256  ;;  %p2705_p11 = scmp.lt.s32.totalorder %s98_s13, %s98_s13 }
  0x20   :  { %p2701_p10 = scmp.ne.s32.totalorder %s98_s13, %s2700_s15  ;;  %p2706_p12 = scmp.lt.s32.totalorder %s2700_s15, %s2700_s15 }
  0x22   :  { %p2707_p13 = por %p2706_p12, %p2705_p11 }
  0x24   :  { %p2708_p0 = pnand %p2707_p13, %p2701_p10 }
  0x26   :  { %2711 = shalt.err (!%p2708_p0)
}
  0x27   :  { %103 = dma.hbm_to_vmem [thread:$0]  %s3424_s6, 256, %s98_s13, [#allocation15], %s2900_s27, %s2900_s27, %s2901_s28  }
  0x28   :  { %s2720_s4 = scalar_lea.vmem %s122_s2, 2048  ;;  %p2725_p2 = scmp.lt.s32.totalorder %s122_s2, %s122_s2 }
  0x29   :  { %p2721_p1 = scmp.ne.s32.totalorder %s122_s2, %s2720_s4  ;;  %p2726_p3 = scmp.lt.s32.totalorder %s2720_s4, %s2720_s4 }
  0x2b   :  { %p2727_p4 = por %p2726_p3, %p2725_p2 }
  0x2d   :  { %p2728_p5 = pnand %p2727_p4, %p2721_p1 }
  0x2f   :  { %2731 = shalt.err (!%p2728_p5)
}
  0x30   :  { %127 = dma.hbm_to_vmem [thread:$0]  %s3426_s8, 2048, %s122_s2, [#allocation18], %s2900_s27, %s2900_s27, %s2901_s28  }
  0x31   :  { %s2904_s20 = smov [#allocation3]   ;;  %s2905_s6 = smov [#allocation7]  }
  0x32   :  { %31 = dma.hbm_to_smem %s3418_s0, 16, %s2904_s20, [#allocation6]  }
  0x33   :  { %s37_s25 = sshll.u32 %s2905_s6, 4  ;;  %s2906_s26 = smov [#allocation10]   ;;  %s38_s25 = int_to_ptr.vmem [resolvable:$true] %s37_s25 }
  0x34   :  { %s61_s29 = sshll.u32 %s2906_s26, 4  ;;  %s2748_s30 = scalar_lea.vmem %s38_s25, 256  ;;  %s62_s29 = int_to_ptr.vmem [resolvable:$true] %s61_s29 }
  0x35   :  { %p2749_p6 = scmp.ne.s32.totalorder %s38_s25, %s2748_s30  ;;  %p2753_p7 = scmp.lt.s32.totalorder %s38_s25, %s38_s25 }
  0x36   :  { %p2754_p8 = scmp.lt.s32.totalorder %s2748_s30, %s2748_s30 }
  0x38   :  { %p2755_p9 = por %p2754_p8, %p2753_p7 }
  0x3a   :  { %p2756_p10 = pnand %p2755_p9, %p2749_p6 }
  0x3c   :  { %2759 = shalt.err (!%p2756_p10)
}
  0x3d   :  { %43 = dma.hbm_to_vmem [thread:$0]  %s3419_s1, 256, %s38_s25, [#allocation4], %s2898_s22, %s2898_s22, %s2899_s23  }
  0x3e   :  { %s2768_s0 = scalar_lea.vmem %s62_s29, 512  ;;  %p2773_p12 = scmp.lt.s32.totalorder %s62_s29, %s62_s29 }
  0x3f   :  { %p2769_p11 = scmp.ne.s32.totalorder %s62_s29, %s2768_s0  ;;  %p2774_p13 = scmp.lt.s32.totalorder %s2768_s0, %s2768_s0 }
  0x41   :  { %p2775_p0 = por %p2774_p13, %p2773_p12 }
  0x43   :  { %p2776_p1 = pnand %p2775_p0, %p2769_p11 }
  0x45   :  { %2779 = shalt.err (!%p2776_p1)
}
  0x46   :  { %67 = dma.hbm_to_vmem [thread:$0]  %s3421_s3, 512, %s62_s29, [#allocation9], %s2898_s22, %s2898_s22, %s2899_s23  }
  0x47   :  { %s2907_s2 = smov [#allocation13]   ;;  %s2908_s16 = smov [#allocation16]  }
  0x48   :  { %s85_s15 = sshll.u32 %s2907_s2, 4  ;;  %s109_s1 = sshll.u32 %s2908_s16, 4  ;;  %s86_s15 = int_to_ptr.vmem [resolvable:$true] %s85_s15  ;;  %s110_s1 = int_to_ptr.vmem [resolvable:$true] %s109_s1 }
  0x49   :  { %s2788_s17 = scalar_lea.vmem %s86_s15, 256  ;;  %p2793_p3 = scmp.lt.s32.totalorder %s86_s15, %s86_s15 }
  0x4a   :  { %p2789_p2 = scmp.ne.s32.totalorder %s86_s15, %s2788_s17  ;;  %p2794_p4 = scmp.lt.s32.totalorder %s2788_s17, %s2788_s17 }
  0x4c   :  { %p2795_p5 = por %p2794_p4, %p2793_p3 }
  0x4e   :  { %p2796_p6 = pnand %p2795_p5, %p2789_p2 }
  0x50   :  { %2799 = shalt.err (!%p2796_p6)
}
  0x51   :  { %91 = dma.hbm_to_vmem [thread:$0]  %s3423_s5, 256, %s86_s15, [#allocation12], %s2900_s27, %s2900_s27, %s2901_s28  }
  0x52   :  { %s2808_s3 = scalar_lea.vmem %s110_s1, 2048  ;;  %p2813_p8 = scmp.lt.s32.totalorder %s110_s1, %s110_s1 }
  0x53   :  { %p2809_p7 = scmp.ne.s32.totalorder %s110_s1, %s2808_s3  ;;  %p2814_p9 = scmp.lt.s32.totalorder %s2808_s3, %s2808_s3 }
  0x55   :  { %p2815_p10 = por %p2814_p9, %p2813_p8 }
  0x57   :  { %p2816_p11 = pnand %p2815_p10, %p2809_p7 }
  0x59   :  { %2819 = shalt.err (!%p2816_p11)
}
  0x5a   :  { %115 = dma.hbm_to_vmem [thread:$0]  %s3425_s7, 2048, %s110_s1, [#allocation15], %s2900_s27, %s2900_s27, %s2901_s28  }
  0x5b   :  { %s2909_s21 = smov [#allocation19]   ;;  %s2910_s6 = smov [#allocation20]  }
  0x5c   :  { %s133_s24 = sshll.u32 %s2909_s21, 4  ;;  %s145_s5 = sshll.u32 %s2910_s6, 4  ;;  %s134_s24 = int_to_ptr.vmem [resolvable:$true] %s133_s24  ;;  %s146_s5 = int_to_ptr.vmem [resolvable:$true] %s145_s5 }
  0x5d   :  { %s2828_s25 = scalar_lea.vmem %s134_s24, 2048  ;;  %p2833_p13 = scmp.lt.s32.totalorder %s134_s24, %s134_s24 }
  0x5e   :  { %p2829_p12 = scmp.ne.s32.totalorder %s134_s24, %s2828_s25  ;;  %p2834_p0 = scmp.lt.s32.totalorder %s2828_s25, %s2828_s25 }
  0x60   :  { %p2835_p1 = por %p2834_p0, %p2833_p13 }
  0x62   :  { %p2836_p2 = pnand %p2835_p1, %p2829_p12 }
  0x64   :  { %2839 = shalt.err (!%p2836_p2)
}
  0x65   :  { %139 = dma.hbm_to_vmem [thread:$0]  %s3427_s9, 2048, %s134_s24, [#allocation18], %s2900_s27, %s2900_s27, %s2901_s28  }
  0x66   :  { %s2848_s7 = scalar_lea.vmem %s146_s5, 2048  ;;  %p2853_p4 = scmp.lt.s32.totalorder %s146_s5, %s146_s5 }
  0x67   :  { %p2849_p3 = scmp.ne.s32.totalorder %s146_s5, %s2848_s7  ;;  %p2854_p5 = scmp.lt.s32.totalorder %s2848_s7, %s2848_s7 }
  0x69   :  { %p2855_p6 = por %p2854_p5, %p2853_p4 }
  0x6b   :  { %p2856_p7 = pnand %p2855_p6, %p2849_p3 }
  0x6d   :  { %2859 = shalt.err (!%p2856_p7)
}
  0x6e   :  { %151 = dma.hbm_to_vmem [thread:$0]  %s3428_s10, 2048, %s146_s5, [#allocation21], %s2898_s22, %s2898_s22, %s2899_s23  }
  0x6f   :  { %2880 = dma.done.wait [#allocation6], 16  }
  0x70   :  { %2881 = vsyncadd [#allocation6], 4294967280 }
  0x71   :  { %2882 = dma.done.wait [#allocation4], 256  }
  0x72   :  { %2883 = vsyncadd [#allocation4], 4294967040 }
  0x73   :  { %2884 = dma.done.wait [#allocation9], 1024  }
  0x74   :  { %2885 = vsyncadd [#allocation9], 4294966272 }
  0x75   :  { %2886 = dma.done.wait [#allocation12], 512  }
  0x76   :  { %2887 = vsyncadd [#allocation12], 4294966784 }
  0x77   :  { %2888 = dma.done.wait [#allocation15], 2304  }
  0x78   :  { %2889 = vsyncadd [#allocation15], 4294964992 }
  0x79   :  { %2890 = dma.done.wait [#allocation18], 4096  }
  0x7a   :  { %2891 = vsyncadd [#allocation18], 4294963200 }
  0x7b   :  { %2892 = dma.done.wait [#allocation21], 2048  }
  0x7c   :  { %2893 = vsyncadd [#allocation21], 4294965248 }
  0x7d   :  { %185 = sfence }
  0x7e   :  { %s191_s9 = sld [smem:[#allocation3]]  ;;  %v2911_v0 = vmov 0.0   ;;  %vm2912_vm0 = vmmov 0   ;;  %v3049_v1 = vld [vmem:[#allocation7] sm:$0xff]  ;;  %v3051_v2 = vld [vmem:[#allocation7 + $0x8] sm:$0xff]  ;;  %v195_v3 = vld [vmem:[#allocation10] sm:$0xff] }
  0x7f   :  { %2349 = vmatprep.subr.bf16.mxu0 %v2911_v0  ;;  %2355 = vmatprep.subr.bf16.mxu1 %v2911_v0  ;;  %v196_v5 = vld [vmem:[#allocation10 + $0x8] sm:$0xff]  ;;  %v2913_v33 = vmov 683565275   ;;  %v2914_v35 = vmov 2475754826   ;;  %s2219_s10 = sld [smem:[#allocation3 + $0x1]] }
  0x80   :  { %2351 = vmatprep.mubr.msk.bf16.mxu0 %vm2912_vm0, %v2911_v0  ;;  %2357 = vmatprep.mubr.msk.bf16.mxu1 %vm2912_vm0, %v2911_v0  ;;  %v2915_v37 = vmov 2131351028   ;;  %v2916_v39 = vmov 2102212464   ;;  %v2917_v41 = vmov 920167782  }
  0x81   :  { %v2918_v48 = vmov 1326507024   ;;  %s2919_s27 = smov [#allocation22]  }
  0x82   :  { %s2155_s28 = sshll.u32 %s2919_s27, 4  ;;  %s2156_s28 = int_to_ptr.vmem [resolvable:$true] %s2155_s28 }
  0x83   :  { %s2860_s12 = scalar_lea.vmem %s2156_s28, 256  ;;  %p2865_p9 = scmp.lt.s32.totalorder %s2156_s28, %s2156_s28 }
  0x84   :  { %v192_v4 = vstv %s191_s9  ;;  %p2861_p8 = scmp.ne.s32.totalorder %s2156_s28, %s2860_s12  ;;  %p2866_p10 = scmp.lt.s32.totalorder %s2860_s12, %s2860_s12 }
  0x85   :  { %v193_v6 = vmul.f32 %v192_v4, %v3049_v1  ;;  %v194_v7 = vmul.f32 %v192_v4, %v3051_v2 }
  0x86   :  { %p2867_p11 = por %p2866_p10, %p2865_p9 }
  0x87   :  { %v3055_v8 = vadd.f32 %v195_v3, %v193_v6  ;;  %v3057_v9 = vadd.f32 %v196_v5, %v194_v7 }
  0x88   :  { %p2868_p12 = pnand %p2867_p11, %p2861_p8 }
  0x89   :  { %v201_v10 = vand.u32 2147483647, %v3055_v8  ;;  %v204_v11 = vand.u32 2139095040, %v3055_v8  ;;  %v304_v12 = vand.u32 2147483647, %v3057_v9  ;;  %v307_v13 = vand.u32 2139095040, %v3057_v9 }
  0x8a   :  { %vm203_vm15 = vcmp.lt.s32.totalorder %v3055_v8, 0 }
  0x8b   :  { %v205_v14 = vshrl.u32 %v204_v11, 23  ;;  %v208_v15 = vand.u32 8388607, %v201_v10  ;;  %v308_v16 = vshrl.u32 %v307_v13, 23  ;;  %v311_v17 = vand.u32 8388607, %v304_v12 }
  0x8d   :  { %v2173_v18 = vadd.s32 4294967169, %v205_v14  ;;  %v209_v19 = vor.u32 8388608, %v208_v15  ;;  %v2177_v20 = vadd.s32 4294967169, %v308_v16  ;;  %v312_v22 = vor.u32 8388608, %v311_v17 }
  0x8f   :  { %v211_v21 = vadd.s32 1, %v2173_v18  ;;  %v314_v23 = vadd.s32 1, %v2177_v20  ;;  %v3067_v24 = vshll.u32 %v209_v19, 8  ;;  %v3069_v29 = vshll.u32 %v312_v22, 8 }
  0x91   :  { %vm212_vm1 = vcmp.gt.s32.totalorder %v211_v21, 0  ;;  %vm315_vm2 = vcmp.gt.s32.totalorder %v314_v23, 0 }
  0x92   :  { %v213_v25 = vsel %vm212_vm1, %v211_v21, 0  ;;  %v316_v28 = vsel %vm315_vm2, %v314_v23, 0  ;;  %vm202_vm1 = vcmp.le.f32.partialorder %v201_v10, 0.7853982  ;;  %vm306_vm2 = vcmp.lt.s32.totalorder %v3057_v9, 0 }
  0x93   :  { %v214_v26 = vshrl.u32 %v213_v25, 5  ;;  %v215_v27 = vand.u32 31, %v213_v25  ;;  %v3071_v30 = vshrl.u32 %v316_v28, 5  ;;  %v318_v31 = vand.u32 31, %v316_v28 }
  0x95   :  { %v216_v32 = vsub.s32 32, %v215_v27  ;;  %v218_v34 = vshll.u32 %v2913_v33, %v215_v27  ;;  %v221_v36 = vshll.u32 %v2914_v35, %v215_v27  ;;  %v224_v38 = vshll.u32 %v2915_v37, %v215_v27 }
  0x96   :  { %v227_v40 = vshll.u32 %v2916_v39, %v215_v27  ;;  %v230_v42 = vshll.u32 %v2917_v41, %v215_v27  ;;  %vm233_vm3 = vcmp.lt.s32.totalorder %v214_v26, 1  ;;  %vm234_vm4 = vcmp.lt.s32.totalorder %v214_v26, 2 }
  0x97   :  { %v217_v43 = vshrl.u32 %v2913_v33, %v216_v32  ;;  %v219_v44 = vshrl.u32 %v2914_v35, %v216_v32  ;;  %v222_v45 = vshrl.u32 %v2915_v37, %v216_v32  ;;  %v225_v46 = vshrl.u32 %v2916_v39, %v216_v32 }
  0x98   :  { %v228_v47 = vshrl.u32 %v2917_v41, %v216_v32  ;;  %v231_v49 = vshrl.u32 %v2918_v48, %v216_v32  ;;  %vm235_vm5 = vcmp.lt.s32.totalorder %v214_v26, 3  ;;  %vm236_vm6 = vcmp.lt.s32.totalorder %v214_v26, 4 }
  0x99   :  { %v220_v50 = vor.u32 %v219_v44, %v218_v34  ;;  %v223_v51 = vor.u32 %v222_v45, %v221_v36  ;;  %v226_v52 = vor.u32 %v225_v46, %v224_v38  ;;  %v319_v53 = vsub.s32 32, %v318_v31 }
  0x9a   :  { %v229_v54 = vor.u32 %v228_v47, %v227_v40  ;;  %v232_v55 = vor.u32 %v231_v49, %v230_v42  ;;  %v321_v56 = vshll.u32 %v2913_v33, %v318_v31  ;;  %v324_v3 = vshll.u32 %v2914_v35, %v318_v31 }
  0x9b   :  { %v237_v57 = vsel %vm233_vm3, %v217_v43, %v220_v50  ;;  %v238_v58 = vsel %vm236_vm6, %v226_v52, 2102212464  ;;  %v241_v59 = vsel %vm233_vm3, %v220_v50, %v223_v51  ;;  %v245_v60 = vsel %vm233_vm3, %v223_v51, %v226_v52 }
  0x9c   :  { %v239_v61 = vsel %vm235_vm5, %v223_v51, %v238_v58  ;;  %v242_v62 = vsel %vm236_vm6, %v229_v54, 920167782  ;;  %v246_v63 = vsel %vm236_vm6, %v232_v55, 1326507024  ;;  %v320_v6 = vshrl.u32 %v2913_v33, %v319_v53 }
  0x9d   :  { %v243_v4 = vsel %vm235_vm5, %v226_v52, %v242_v62  ;;  %v247_v5 = vsel %vm235_vm5, %v229_v54, %v246_v63  ;;  %v322_v7 = vshrl.u32 %v2914_v35, %v319_v53  ;;  %v240_v11 = vsel %vm234_vm4, %v237_v57, %v239_v61 }
  0x9e   :  { %v244_v13 = vsel %vm234_vm4, %v241_v59, %v243_v4  ;;  %v248_v14 = vsel %vm234_vm4, %v245_v60, %v247_v5  ;;  %v325_v15 = vshrl.u32 %v2915_v37, %v319_v53  ;;  %v327_v22 = vshll.u32 %v2915_v37, %v318_v31 }
  0x9f   :  { %v3099_v16 = vmul.u32.u64.low %v3067_v24, %v248_v14  ;;  %v3100_v17 = vmul.u32.u64.high %v3067_v24, %v248_v14, %v3099_v16  ;;  %v3103_v18 = vmul.u32.u64.low %v3067_v24, %v244_v13  ;;  %v3104_v19 = vmul.u32.u64.high %v3067_v24, %v244_v13, %v3103_v18 }
  0xa0   :  { %v323_v20 = vor.u32 %v322_v7, %v321_v56  ;;  %v326_v21 = vor.u32 %v325_v15, %v324_v3  ;;  %v328_v23 = vshrl.u32 %v2916_v39, %v319_v53  ;;  %v330_v25 = vshll.u32 %v2916_v39, %v318_v31 }
  0xa1   :  { %v331_v26 = vshrl.u32 %v2917_v41, %v319_v53  ;;  %v333_v27 = vshll.u32 %v2917_v41, %v318_v31  ;;  %v334_v28 = vshrl.u32 %v2918_v48, %v319_v53  ;;  %v256_v32 = vmul.u32 %v3067_v24, %v240_v11 }
  0xa2   :  { %v329_v34 = vor.u32 %v328_v23, %v327_v22  ;;  %vm336_vm7 = vcmp.lt.s32.totalorder %v3071_v30, 1  ;;  %vm337_vm8 = vcmp.lt.s32.totalorder %v3071_v30, 2  ;;  %vm258_vm9 = vc.u32 %v3100_v17, %v3103_v18 }
  0xa3   :  { %v259_v36 = vadd.s32 1, %v3104_v19  ;;  %v332_v38 = vor.u32 %v331_v26, %v330_v25  ;;  %vm338_vm10 = vcmp.lt.s32.totalorder %v3071_v30, 3  ;;  %v335_v40 = vor.u32 %v334_v28, %v333_v27 }
  0xa4   :  { %vm339_vm11 = vcmp.lt.s32.totalorder %v3071_v30, 4  ;;  %v340_v31 = vsel %vm336_vm7, %v320_v6, %v323_v20  ;;  %v344_v42 = vsel %vm336_vm7, %v323_v20, %v326_v21  ;;  %v348_v45 = vsel %vm336_vm7, %v326_v21, %v329_v34 }
  0xa5   :  { %v260_v43 = vsel %vm258_vm9, %v259_v36, %v3104_v19  ;;  %v341_v24 = vsel %vm339_vm11, %v329_v34, 2102212464  ;;  %v345_v44 = vsel %vm339_vm11, %v332_v38, 920167782  ;;  %v349_v50 = vsel %vm339_vm11, %v335_v40, 1326507024 }
  0xa6   :  { %v261_v46 = vadd.s32 %v260_v43, %v256_v32  ;;  %v342_v47 = vsel %vm338_vm10, %v326_v21, %v341_v24  ;;  %v346_v49 = vsel %vm338_vm10, %v329_v34, %v345_v44  ;;  %v350_v53 = vsel %vm338_vm10, %v332_v38, %v349_v50 }
  0xa7   :  { %v343_v51 = vsel %vm337_vm8, %v340_v31, %v342_v47  ;;  %v347_v52 = vsel %vm337_vm8, %v344_v42, %v346_v49  ;;  %v351_v55 = vsel %vm337_vm8, %v348_v45, %v350_v53  ;;  %v257_v19 = vadd.s32 %v3103_v18, %v3100_v17 }
  0xa8   :  { %v262_v54 = vadd.s32 536870912, %v261_v46  ;;  %v3127_v56 = vmul.u32.u64.low %v3069_v29, %v347_v52  ;;  %v3128_v57 = vmul.u32.u64.high %v3069_v29, %v347_v52, %v3127_v56  ;;  %v359_v61 = vmul.u32 %v3069_v29, %v343_v51 }
  0xa9   :  { %v3131_v58 = vmul.u32.u64.low %v3069_v29, %v351_v55  ;;  %v3132_v59 = vmul.u32.u64.high %v3069_v29, %v351_v55, %v3131_v58  ;;  %vm305_vm3 = vcmp.le.f32.partialorder %v304_v12, 0.7853982  ;;  %vm293_vm10 = vweird.f32 %v3055_v8 }
  0xaa   :  { %v263_v60 = vshrl.u32 %v262_v54, 30  ;;  %v362_v63 = vadd.s32 1, %v3128_v57 }
  0xab   :  { %vm361_vm12 = vc.u32 %v3132_v59, %v3127_v56  ;;  %v360_v31 = vadd.s32 %v3127_v56, %v3132_v59 }
  0xac   :  { %v264_v62 = vshll.u32 %v263_v60, 30  ;;  %v363_v30 = vsel %vm361_vm12, %v362_v63, %v3128_v57  ;;  %v287_v49 = vsub.s32 4, %v263_v60 }
  0xad   :  { %v364_v4 = vadd.s32 %v363_v30, %v359_v61 }
  0xae   :  { %v265_v3 = vsub.s32 %v261_v46, %v264_v62  ;;  %v288_v56 = vsel %vm203_vm15, %v287_v49, %v263_v60 }
  0xaf   :  { %v365_v6 = vadd.s32 536870912, %v364_v4  ;;  %v290_v61 = vsel %vm202_vm1, 0, %v288_v56  ;;  %v2583_v56 = vld [vmem:[#allocation17 + $0x38] sm:$0xff]  }
  0xb0   :  { %v267_v5 = vsub.s32 0, %v265_v3 }
  0xb1   :  { %v366_v11 = vshrl.u32 %v365_v6, 30 }
  0xb2   :  { %v2174_v7 = vmin.u32 %v267_v5, %v265_v3 }
  0xb3   :  { %v367_v14 = vshll.u32 %v366_v11, 30  ;;  %v390_v59 = vsub.s32 4, %v366_v11 }
  0xb4   :  { %v269_v13 = vclz %v2174_v7 }
  0xb5   :  { %v368_v16 = vsub.s32 %v364_v4, %v367_v14  ;;  %v391_v63 = vsel %vm306_vm2, %v390_v59, %v366_v11  ;;  %v294_v4 = vand.u32 3, %v290_v61  ;;  %v2590_v59 = vld [vmem:[#allocation16 + $0x20] sm:$0xff]  }
  0xb6   :  { %v2175_v15 = vadd.s32 4294967294, %v269_v13  ;;  %v393_v5 = vsel %vm305_vm3, 0, %v391_v63 }
  0xb7   :  { %v370_v20 = vsub.s32 0, %v368_v16  ;;  %v607_v7 = vadd.s32 3, %v393_v5  ;;  %vm296_vm4 = vcmp.eq.s32.totalorder %v294_v4, 0  ;;  %vm299_vm5 = vcmp.eq.s32.totalorder %v294_v4, 2 }
  0xb8   :  { %vm2176_vm13 = vcmp.lt.s32.totalorder %v2175_v15, 0  ;;  %vm295_vm8 = vcmp.lt.s32.totalorder %v294_v4, 2  ;;  %v397_v12 = vand.u32 3, %v393_v5  ;;  %v1121_v4 = vld [vmem:[#allocation10 + $0x18] sm:$0xff] }
  0xb9   :  { %v272_v29 = vsel %vm2176_vm13, 0, %v2175_v15  ;;  %v2178_v25 = vmin.u32 %v370_v20, %v368_v16  ;;  %v608_v11 = vand.u32 3, %v607_v7 }
  0xba   :  { %v273_v21 = vsub.s32 32, %v272_v29  ;;  %v274_v22 = vshll.u32 %v265_v3, %v272_v29  ;;  %v277_v23 = vsub.s32 4294967266, %v272_v29  ;;  %v503_v3 = vadd.s32 3, %v290_v61  ;;  %v2587_v61 = vld [vmem:[#allocation17 + $0x28] sm:$0xff]  }
  0xbb   :  { %v372_v28 = vclz %v2178_v25  ;;  %vm402_vm11 = vcmp.eq.s32.totalorder %v397_v12, 2  ;;  %vm613_vm12 = vcmp.eq.s32.totalorder %v608_v11, 2  ;;  %vm398_vm13 = vcmp.lt.s32.totalorder %v397_v12, 2 }
  0xbc   :  { %v275_v26 = vshrl.u32 %v257_v19, %v273_v21  ;;  %v278_v27 = vadd.s32 127, %v277_v23  ;;  %v504_v60 = vand.u32 3, %v503_v3 }
  0xbd   :  { %v2179_v36 = vadd.s32 4294967294, %v372_v28 }
  0xbe   :  { %v276_v32 = vor.u32 %v275_v26, %v274_v22  ;;  %v279_v34 = vshll.u32 %v278_v27, 23  ;;  %vm506_vm6 = vcmp.eq.s32.totalorder %v504_v60, 0  ;;  %vm509_vm7 = vcmp.eq.s32.totalorder %v504_v60, 2  ;;  %v199_v27 = vld [vmem:[#allocation8] sm:$0xff] }
  0xbf   :  { %vm2180_vm14 = vcmp.lt.s32.totalorder %v2179_v36, 0  ;;  %vm505_vm9 = vcmp.lt.s32.totalorder %v504_v60, 2 }
  0xc0   :  { %v280_v38 = vor.u32 4788187, %v279_v34  ;;  %v283_v40 = vcvt.s32.f32 %v276_v32  ;;  %v375_v17 = vsel %vm2180_vm14, 0, %v2179_v36  ;;  %vm399_vm14 = vcmp.eq.s32.totalorder %v397_v12, 0 }
  0xc1   :  { %v376_v18 = vsub.s32 32, %v375_v17  ;;  %v377_v43 = vshll.u32 %v368_v16, %v375_v17  ;;  %v380_v24 = vsub.s32 4294967266, %v375_v17 }
  0xc2   :  { %v281_v42 = vand.u32 2147483647, %v280_v38 }
  0xc3   :  { %v378_v45 = vshrl.u32 %v360_v31, %v376_v18  ;;  %v381_v46 = vadd.s32 127, %v380_v24 }
  0xc4   :  { %v284_v44 = vmul.f32 %v283_v40, %v281_v42 }
  0xc5   :  { %v379_v50 = vor.u32 %v378_v45, %v377_v43  ;;  %v382_v51 = vshll.u32 %v381_v46, 23 }
  0xc6   :  { %v285_v47 = vxor.u32 2147483648, %v284_v44 }
  0xc7   :  { %v383_v54 = vor.u32 4788187, %v382_v51  ;;  %v386_v55 = vcvt.s32.f32 %v379_v50  ;;  %v2580_v50 = vld [vmem:[#allocation11] sm:$0xff]  }
  0xc8   :  { %v286_v52 = vsel %vm203_vm15, %v285_v47, %v284_v44  ;;  %vm610_vm15 = vcmp.eq.s32.totalorder %v608_v11, 0 }
  0xc9   :  { %v289_v53 = vsel %vm202_vm1, %v3055_v8, %v286_v52  ;;  %v384_v57 = vand.u32 2147483647, %v383_v54  ;;  %vm609_vm1 = vcmp.lt.s32.totalorder %v608_v11, 2  ;;  %v200_v8 = vld [vmem:[#allocation8 + $0x8] sm:$0xff]  ;;  %v2586_v54 = vld [vmem:[#allocation16 + $0x30] sm:$0xff]  }
  0xca   :  { %2634 = vcosq.f32 %v289_v53 }
  0xcb   :  { %2636 = vsinq.f32 %v289_v53  ;;  %v387_v58 = vmul.f32 %v386_v55, %v384_v57  ;;  %v2584_v53 = vld [vmem:[#allocation16 + $0x38] sm:$0xff]   ;;  %v2582_v55 = vld [vmem:[#allocation14] sm:$0xff]   ;;  %v2588_v57 = vld [vmem:[#allocation16 + $0x28] sm:$0xff]  }
  0xcd   :  { %v388_v10 = vxor.u32 2147483648, %v387_v58 }
  0xcf   :  { %v389_v62 = vsel %vm306_vm2, %v388_v10, %v387_v58  ;;  %vm396_vm2 = vweird.f32 %v3057_v9  ;;  %v2585_v58 = vld [vmem:[#allocation17 + $0x30] sm:$0xff]   ;;  %v2589_v10 = vld [vmem:[#allocation17 + $0x20] sm:$0xff]  }
  0xd0   :  { %v392_v30 = vsel %vm305_vm3, %v3057_v9, %v389_v62  ;;  %vm628_vm3 = vcmask 130048   ;;  %v2581_v9 = vld [vmem:[#allocation13] sm:$0xff]   ;;  %v1116_v62 = vstv %s2219_s10 }
  0xd1   :  { %2638 = vcosq.f32 %v392_v30  ;;  %v1117_v63 = vmul.f32 %v1116_v62, %v3049_v1  ;;  %v1118_v3 = vmul.f32 %v1116_v62, %v3051_v2 }
  0xd2   :  { %2640 = vsinq.f32 %v392_v30  ;;  %v1120_v30 = vld [vmem:[#allocation10 + $0x10] sm:$0xff] }
  0xd3   :  { %v3172_v5 = vadd.f32 %v1120_v30, %v1117_v63  ;;  %v3174_v60 = vadd.f32 %v1121_v4, %v1118_v3  ;;  %v2595_v3 = vld [vmem:[#allocation17 + $0x8] sm:$0xff]  }
  0xd4   :  { %v2596_v4 = vld [vmem:[#allocation16 + $0x8] sm:$0xff]  }
  0xd5   :  { %v1233_v7 = vand.u32 2139095040, %v3174_v60 }
  0xd7   :  { %v2635_v6 = vpop.eup %2634 }
  0xd8   :  { %v2637_v13 = vpop.eup %2636  ;;  %v300_v14 = vxor.u32 2147483648, %v2635_v6 }
  0xd9   :  { %v297_v15 = vxor.u32 2147483648, %v2637_v13 }
  0xda   :  { %v301_v19 = vsel %vm299_vm5, %v300_v14, %v2637_v13  ;;  %v511_v20 = vsel %vm509_vm7, %v300_v14, %v2637_v13  ;;  %v1234_v14 = vshrl.u32 %v1233_v7, 23 }
  0xdb   :  { %v298_v16 = vsel %vm296_vm4, %v2635_v6, %v297_v15  ;;  %v508_v29 = vsel %vm506_vm6, %v2635_v6, %v297_v15  ;;  %v1130_v6 = vand.u32 2139095040, %v3172_v5 }
  0xdc   :  { %v302_v21 = vsel %vm295_vm8, %v298_v16, %v301_v19  ;;  %v512_v22 = vsel %vm505_vm9, %v508_v29, %v511_v20  ;;  %v2224_v12 = vadd.s32 4294967169, %v1234_v14 }
  0xdd   :  { %v303_v28 = vsel %vm293_vm10, nan, %v302_v21  ;;  %v513_v34 = vsel %vm293_vm10, nan, %v512_v22  ;;  %v1131_v13 = vshrl.u32 %v1130_v6, 23  ;;  %v1127_v22 = vand.u32 2147483647, %v3172_v5 }
  0xde   :  { %v2639_v23 = vpop.eup %2638  ;;  %v407_v17 = vmul.f32 %v303_v28, %v199_v27  ;;  %v618_v43 = vmul.f32 %v513_v34, %v199_v27  ;;  %v1240_v16 = vadd.s32 1, %v2224_v12 }
  0xdf   :  { %v2641_v25 = vpop.eup %2640  ;;  %v403_v26 = vxor.u32 2147483648, %v2639_v23  ;;  %v2220_v15 = vadd.s32 4294967169, %v1131_v13 }
  0xe0   :  { %v400_v32 = vxor.u32 2147483648, %v2641_v25  ;;  %vm1241_vm5 = vcmp.gt.s32.totalorder %v1240_v16, 0 }
  0xe1   :  { %v404_v36 = vsel %vm402_vm11, %v403_v26, %v2641_v25  ;;  %v615_v38 = vsel %vm613_vm12, %v403_v26, %v2641_v25  ;;  %v1137_v11 = vadd.s32 1, %v2220_v15  ;;  %v1242_v2 = vsel %vm1241_vm5, %v1240_v16, 0 }
  0xe2   :  { %v401_v40 = vsel %vm399_vm14, %v2639_v23, %v400_v32  ;;  %v612_v31 = vsel %vm610_vm15, %v2639_v23, %v400_v32  ;;  %v1244_v29 = vand.u32 31, %v1242_v2  ;;  %v1230_v26 = vand.u32 2147483647, %v3174_v60 }
  0xe3   :  { %v405_v42 = vsel %vm398_vm13, %v401_v40, %v404_v36  ;;  %v616_v18 = vsel %vm609_vm1, %v612_v31, %v615_v38  ;;  %vm1138_vm4 = vcmp.gt.s32.totalorder %v1137_v11, 0  ;;  %v1134_v36 = vand.u32 8388607, %v1127_v22  ;;  %v2591_v31 = vld [vmem:[#allocation17 + $0x18] sm:$0xff]  }
  0xe4   :  { %v406_v24 = vsel %vm396_vm2, nan, %v405_v42  ;;  %v617_v44 = vsel %vm396_vm2, nan, %v616_v18  ;;  %v1139_v1 = vsel %vm1138_vm4, %v1137_v11, 0  ;;  %v3180_v21 = vsub.s32 32, %v1244_v29 }
  0xe5   :  { %v408_v45 = vmul.f32 %v406_v24, %v200_v8  ;;  %v619_v46 = vmul.f32 %v617_v44, %v200_v8  ;;  %v1141_v19 = vand.u32 31, %v1139_v1  ;;  %v1256_v32 = vshll.u32 %v2916_v39, %v1244_v29  ;;  %v2592_v24 = vld [vmem:[#allocation16 + $0x18] sm:$0xff]  }
  0xe6   :  { %v1257_v34 = vshrl.u32 %v2917_v41, %v3180_v21  ;;  %v3195_v38 = vshrl.u32 %v1139_v1, 5  ;;  %vm1129_vm4 = vcmp.lt.s32.totalorder %v3172_v5, 0  ;;  %vm1232_vm5 = vcmp.lt.s32.totalorder %v3174_v60, 0 }
  0xe7   :  { %v409_v47 = vpack.c.bf16 %v408_v45, %v407_v17  ;;  %v620_v49 = vpack.c.bf16 %v619_v46, %v618_v43  ;;  %v3178_v20 = vsub.s32 32, %v1141_v19  ;;  %v1153_v23 = vshll.u32 %v2916_v39, %v1141_v19 }
  0xe8   :  { %v1156_v27 = vshll.u32 %v2917_v41, %v1141_v19  ;;  %v1144_v8 = vshll.u32 %v2913_v33, %v1141_v19  ;;  %v1147_v42 = vshll.u32 %v2914_v35, %v1141_v19  ;;  %v1150_v18 = vshll.u32 %v2915_v37, %v1141_v19 }
  0xe9   :  { %2350 = vmatpush3.bf16.msra.mxu0 %v409_v47  ;;  %v675_v51 = vsub.bf16 %v620_v49, %v409_v47  ;;  %v727_v52 = vadd.bf16 %v620_v49, %v409_v47  ;;  %v1154_v25 = vshrl.u32 %v2917_v41, %v3178_v20  ;;  %v1157_v28 = vshrl.u32 %v2918_v48, %v3178_v20 }
  0xea   :  { %2361 = vmatprep.subr.bf16.mxu0 %v2911_v0  ;;  %v1145_v40 = vshrl.u32 %v2914_v35, %v3178_v20  ;;  %v1148_v17 = vshrl.u32 %v2915_v37, %v3178_v20  ;;  %v1151_v43 = vshrl.u32 %v2916_v39, %v3178_v20  ;;  %v3206_v45 = vshrl.u32 %v1242_v2, 5  ;;  %v2597_v2 = vld [vmem:[#allocation17] sm:$0xff]  }
  0xeb   :  { %2356 = vmatpush3.bf16.msra.mxu1 %v675_v51  ;;  %v1155_v44 = vor.u32 %v1154_v25, %v1153_v23  ;;  %v1259_v46 = vshll.u32 %v2917_v41, %v1244_v29  ;;  %v1260_v47 = vshrl.u32 %v2918_v48, %v3180_v21  ;;  %v1158_v49 = vor.u32 %v1157_v28, %v1156_v27  ;;  %v2598_v25 = vld [vmem:[#allocation16] sm:$0xff]  }
  0xec   :  { %2352 = vmatmul.mubr.msk.bf16.vlgmr.msra.gmra.mxu0 %vm628_vm3, %v2580_v50  ;;  %2367 = vmatprep.subr.bf16.mxu1 %v2911_v0  ;;  %v1247_v50 = vshll.u32 %v2913_v33, %v1244_v29  ;;  %v1248_v51 = vshrl.u32 %v2914_v35, %v3180_v21  ;;  %vm1162_vm6 = vcmp.lt.s32.totalorder %v3195_v38, 4  ;;  %v1251_v41 = vshrl.u32 %v2915_v37, %v3180_v21 }
  0xed   :  { %2362 = vmatpush3.bf16.msra.mxu0 %v727_v52  ;;  %2363 = vmatprep.mubr.msk.bf16.mxu0 %vm2912_vm0, %v2911_v0  ;;  %v1250_v52 = vshll.u32 %v2914_v35, %v1244_v29  ;;  %v1254_v48 = vshrl.u32 %v2916_v39, %v3180_v21  ;;  %v1258_v35 = vor.u32 %v1257_v34, %v1256_v32  ;;  %vm1265_vm7 = vcmp.lt.s32.totalorder %v3206_v45, 4 }
  0xee   :  { %2358 = vmatmul.mubr.msk.bf16.vlgmr.msra.gmra.mxu1 %vm628_vm3, %v2581_v9  ;;  %2387 = vmatprep.subr.bf16.mxu0 %v2911_v0  ;;  %v1253_v9 = vshll.u32 %v2915_v37, %v1244_v29  ;;  %v1135_v37 = vor.u32 8388608, %v1134_v36  ;;  %vm1159_vm8 = vcmp.lt.s32.totalorder %v3195_v38, 1  ;;  %vm1161_vm9 = vcmp.lt.s32.totalorder %v3195_v38, 3 }
  0xef   :  { %2368 = vmatpush3.bf16.msra.mxu1 %v2584_v53  ;;  %2383 = vmatprep.mubr.msk.bf16.mxu1 %vm2912_vm0, %v2911_v0  ;;  %v2593_v53 = vld [vmem:[#allocation17 + $0x10] sm:$0xff]   ;;  %v1168_v39 = vsel %vm1162_vm6, %v1155_v44, 920167782  ;;  %v1252_v62 = vor.u32 %v1251_v41, %v1250_v52  ;;  %vm1160_vm10 = vcmp.lt.s32.totalorder %v3195_v38, 2  ;;  %vm1262_vm11 = vcmp.lt.s32.totalorder %v3206_v45, 1 }
  0xf0   :  { %2369 = vmatprep.subr.bf16.mxu1 %v2911_v0  ;;  %v1255_v63 = vor.u32 %v1254_v48, %v1253_v9  ;;  %vm1264_vm12 = vcmp.lt.s32.totalorder %v3206_v45, 3  ;;  %v1271_v30 = vsel %vm1265_vm7, %v1258_v35, 920167782  ;;  %v1175_v11 = vshll.u32 %v1135_v37, 8 }
  0xf1   :  { %vm1263_vm13 = vcmp.lt.s32.totalorder %v3206_v45, 2 }
  0xf2   :  { %v1272_v1 = vsel %vm1264_vm12, %v1255_v63, %v1271_v30  ;;  %v1274_v29 = vsel %vm1262_vm11, %v1252_v62, %v1255_v63 }
  0xf3   :  { %2370 = vmatpush3.bf16.msra.mxu1 %v2586_v54  ;;  %v3223_v54 = vor.u32 %v1145_v40, %v1144_v8  ;;  %v1143_v40 = vshrl.u32 %v2913_v33, %v3178_v20 }
  0xf4   :  { %2364 = vmatmul.mubr.msk.bf16.vlgmr.msra.gmra.mxu0 %vm628_vm3, %v2582_v55  ;;  %2371 = vmatprep.subr.bf16.mxu1 %v2911_v0  ;;  %v3225_v55 = vor.u32 %v1148_v17, %v1147_v42 }
  0xf5   :  { %2388 = vmatpush3.bf16.msra.mxu0 %v2583_v56  ;;  %2403 = vmatprep.mubr.msk.bf16.mxu0 %vm2912_vm0, %v2911_v0  ;;  %v2594_v56 = vld [vmem:[#allocation16 + $0x10] sm:$0xff]   ;;  %v1163_v20 = vsel %vm1159_vm8, %v1143_v40, %v3223_v54 }
  0xf6   :  { %2389 = vmatprep.subr.bf16.mxu0 %v2911_v0  ;;  %v1167_v6 = vsel %vm1159_vm8, %v3223_v54, %v3225_v55 }
  0xf7   :  { %2372 = vmatpush3.bf16.msra.mxu1 %v2588_v57  ;;  %v1152_v57 = vor.u32 %v1151_v43, %v1150_v18 }
  0xf8   :  { %2373 = vmatprep.subr.bf16.mxu1 %v2911_v0 }
  0xf9   :  { %2390 = vmatpush3.bf16.msra.mxu0 %v2585_v58  ;;  %v1237_v58 = vand.u32 8388607, %v1230_v26  ;;  %v1169_v7 = vsel %vm1161_vm9, %v1152_v57, %v1168_v39  ;;  %v1171_v15 = vsel %vm1159_vm8, %v3225_v55, %v1152_v57  ;;  %v1164_v17 = vsel %vm1162_vm6, %v1152_v57, 2102212464 }
  0xfa   :  { %2391 = vmatprep.subr.bf16.mxu0 %v2911_v0  ;;  %v1170_v19 = vsel %vm1160_vm10, %v1167_v6, %v1169_v7 }
  0xfb   :  { %2374 = vmatpush3.bf16.msra.mxu1 %v2590_v59  ;;  %v1261_v59 = vor.u32 %v1260_v47, %v1259_v46  ;;  %v1238_v13 = vor.u32 8388608, %v1237_v58  ;;  %v3274_v34 = vmul.u32.u64.low %v1175_v11, %v1170_v19  ;;  %v3275_v36 = vmul.u32.u64.high %v1175_v11, %v1170_v19, %v3274_v34 }
  0xfc   :  { %2375 = vmatprep.subr.bf16.mxu1 %v2911_v0  ;;  %v1267_v47 = vsel %vm1265_vm7, %v1255_v63, 2102212464 }
  0xfd   :  { %2392 = vmatpush3.bf16.msra.mxu0 %v2587_v61  ;;  %v1172_v61 = vsel %vm1162_vm6, %v1158_v49, 1326507024  ;;  %v1275_v14 = vsel %vm1265_vm7, %v1261_v59, 1326507024  ;;  %v1278_v28 = vshll.u32 %v1238_v13, 8  ;;  %v1165_v49 = vsel %vm1161_vm9, %v3225_v55, %v1164_v17 }
  0xfe   :  { %2393 = vmatprep.subr.bf16.mxu0 %v2911_v0  ;;  %v1173_v12 = vsel %vm1161_vm9, %v1155_v44, %v1172_v61  ;;  %v1276_v23 = vsel %vm1264_vm12, %v1258_v35, %v1275_v14  ;;  %vm1128_vm6 = vcmp.le.f32.partialorder %v1127_v22, 0.7853982  ;;  %vm1231_vm7 = vcmp.le.f32.partialorder %v1230_v26, 0.7853982 }
  0xff   :  { %2376 = vmatpush3.bf16.msra.mxu1 %v2592_v24  ;;  %v1174_v27 = vsel %vm1160_vm10, %v1171_v15, %v1173_v12  ;;  %v1277_v8 = vsel %vm1263_vm13, %v1274_v29, %v1276_v23  ;;  %v1246_v24 = vshrl.u32 %v2913_v33, %v3180_v21  ;;  %v1268_v33 = vsel %vm1264_vm12, %v1252_v62, %v1267_v47 }
 0x100   :  { %2377 = vmatprep.subr.bf16.mxu1 %v2911_v0  ;;  %v3292_v44 = vmul.u32.u64.low %v1278_v28, %v1277_v8  ;;  %v3293_v46 = vmul.u32.u64.high %v1278_v28, %v1277_v8, %v3292_v44  ;;  %v1166_v21 = vsel %vm1160_vm10, %v1163_v20, %v1165_v49 }
 0x101   :  { %2394 = vmatpush3.bf16.msra.mxu0 %v2589_v10  ;;  %v1249_v10 = vor.u32 %v1248_v51, %v1247_v50  ;;  %v1185_v51 = vadd.s32 1, %v3275_v36  ;;  %v1182_v9 = vmul.u32 %v1175_v11, %v1166_v21 }
 0x102   :  { %2395 = vmatprep.subr.bf16.mxu0 %v2911_v0 }
 0x103   :  { %2378 = vmatpush3.bf16.msra.mxu1 %v2594_v56  ;;  %v1270_v16 = vsel %vm1262_vm11, %v1249_v10, %v1252_v62  ;;  %v1266_v50 = vsel %vm1262_vm11, %v1246_v24, %v1249_v10 }
 0x104   :  { %2379 = vmatprep.subr.bf16.mxu1 %v2911_v0  ;;  %v1273_v32 = vsel %vm1263_vm13, %v1270_v16, %v1272_v1  ;;  %v1269_v52 = vsel %vm1263_vm13, %v1266_v50, %v1268_v33 }
 0x105   :  { %2396 = vmatpush3.bf16.msra.mxu0 %v2591_v31  ;;  %v3282_v31 = vmul.u32.u64.low %v1175_v11, %v1174_v27  ;;  %v3283_v42 = vmul.u32.u64.high %v1175_v11, %v1174_v27, %v3282_v31  ;;  %v3287_v18 = vmul.u32.u64.low %v1278_v28, %v1273_v32  ;;  %v3288_v43 = vmul.u32.u64.high %v1278_v28, %v1273_v32, %v3287_v18 }
 0x106   :  { %2397 = vmatprep.subr.bf16.mxu0 %v2911_v0 }
 0x107   :  { %2380 = vmatpush3.bf16.msra.mxu1 %v2596_v4  ;;  %vm1184_vm14 = vc.u32 %v3283_v42, %v3274_v34  ;;  %v1288_v41 = vadd.s32 1, %v3288_v43  ;;  %vm1287_vm15 = vc.u32 %v3293_v46, %v3287_v18  ;;  %v1183_v12 = vadd.s32 %v3274_v34, %v3283_v42 }
 0x108   :  { %2381 = vmatprep.subr.bf16.mxu1 %v2911_v0  ;;  %v1186_v48 = vsel %vm1184_vm14, %v1185_v51, %v3275_v36  ;;  %v1286_v1 = vadd.s32 %v3287_v18, %v3293_v46 }
 0x109   :  { %2398 = vmatpush3.bf16.msra.mxu0 %v2593_v53  ;;  %v1285_v53 = vmul.u32 %v1278_v28, %v1269_v52  ;;  %v1289_v54 = vsel %vm1287_vm15, %v1288_v41, %v3288_v43  ;;  %v1187_v55 = vadd.s32 %v1186_v48, %v1182_v9 }
 0x10a   :  { %2399 = vmatprep.subr.bf16.mxu0 %v2911_v0 }
 0x10b   :  { %2382 = vmatpush3.bf16.msra.mxu1 %v2598_v25  ;;  %v1290_v38 = vadd.s32 %v1289_v54, %v1285_v53  ;;  %v1188_v35 = vadd.s32 536870912, %v1187_v55 }
 0x10c   :  { %2407 = vmatprep.subr.bf16.mxu1 %v2911_v0 }
 0x10d   :  { %2400 = vmatpush3.bf16.msra.mxu0 %v2595_v3  ;;  %v1291_v56 = vadd.s32 536870912, %v1290_v38  ;;  %v1189_v57 = vshrl.u32 %v1188_v35, 30 }
 0x10e   :  { %2401 = vmatprep.subr.bf16.mxu0 %v2911_v0 }
 0x10f   :  { %v1292_v58 = vshrl.u32 %v1291_v56, 30  ;;  %v1190_v59 = vshll.u32 %v1189_v57, 30  ;;  %v1213_v33 = vsub.s32 4, %v1189_v57 }
 0x111   :  { %2402 = vmatpush3.bf16.msra.mxu0 %v2597_v2  ;;  %v1293_v37 = vshll.u32 %v1292_v58, 30  ;;  %v1191_v45 = vsub.s32 %v1187_v55, %v1190_v59  ;;  %v1316_v21 = vsub.s32 4, %v1292_v58  ;;  %v1214_v51 = vsel %vm1129_vm4, %v1213_v33, %v1189_v57  ;;  %v2599_v33 = vld [vmem:[#allocation19 + $0x38] sm:$0xff]  }
 0x112   :  { %2427 = vmatprep.subr.bf16.mxu0 %v2911_v0  ;;  %v1216_v41 = vsel %vm1128_vm6, 0, %v1214_v51  ;;  %v2601_v51 = vld [vmem:[#allocation11 + $0x8] sm:$0xff]  }
 0x113   :  { %v1294_v39 = vsub.s32 %v1290_v38, %v1293_v37  ;;  %v1193_v61 = vsub.s32 0, %v1191_v45  ;;  %v1317_v52 = vsel %vm1232_vm5, %v1316_v21, %v1292_v58  ;;  %v1220_v53 = vand.u32 3, %v1216_v41 }
 0x114   :  { %v1319_v22 = vsel %vm1231_vm7, 0, %v1317_v52  ;;  %v1429_v26 = vadd.s32 3, %v1216_v41  ;;  %v2602_v41 = vld [vmem:[#allocation19 + $0x28] sm:$0xff]  }
 0x115   :  { %v1296_v10 = vsub.s32 0, %v1294_v39  ;;  %v2221_v62 = vmin.u32 %v1193_v61, %v1191_v45  ;;  %v1323_v38 = vand.u32 3, %v1319_v22  ;;  %v1533_v35 = vadd.s32 3, %v1319_v22  ;;  %v2604_v22 = vld [vmem:[#allocation13 + $0x8] sm:$0xff]  }
 0x116   :  { %vm1225_vm8 = vcmp.eq.s32.totalorder %v1220_v53, 2  ;;  %vm1222_vm9 = vcmp.eq.s32.totalorder %v1220_v53, 0  ;;  %vm1221_vm12 = vcmp.lt.s32.totalorder %v1220_v53, 2  ;;  %v2605_v53 = vld [vmem:[#allocation19 + $0x18] sm:$0xff]  }
 0x117   :  { %v2225_v63 = vmin.u32 %v1296_v10, %v1294_v39  ;;  %v1195_v3 = vclz %v2221_v62  ;;  %vm1325_vm10 = vcmp.eq.s32.totalorder %v1323_v38, 0  ;;  %vm1328_vm11 = vcmp.eq.s32.totalorder %v1323_v38, 2 }
 0x118   :  { %v1534_v57 = vand.u32 3, %v1533_v35  ;;  %vm1324_vm13 = vcmp.lt.s32.totalorder %v1323_v38, 2  ;;  %v2609_v38 = vld [vmem:[#allocation19] sm:$0xff]   ;;  %v2610_v35 = vld [vmem:[#allocation17 + $0x78] sm:$0xff]  }
 0x119   :  { %v1298_v30 = vclz %v2225_v63  ;;  %v2222_v4 = vadd.s32 4294967294, %v1195_v3 }
 0x11b   :  { %v2226_v6 = vadd.s32 4294967294, %v1298_v30  ;;  %vm2223_vm1 = vcmp.lt.s32.totalorder %v2222_v4, 0 }
 0x11c   :  { %v1198_v7 = vsel %vm2223_vm1, 0, %v2222_v4  ;;  %vm1536_vm1 = vcmp.eq.s32.totalorder %v1534_v57, 0 }
 0x11d   :  { %vm2227_vm2 = vcmp.lt.s32.totalorder %v2226_v6, 0  ;;  %v1203_v14 = vsub.s32 4294967266, %v1198_v7  ;;  %v1199_v11 = vsub.s32 32, %v1198_v7  ;;  %v1200_v29 = vshll.u32 %v1191_v45, %v1198_v7 }
 0x11e   :  { %v1301_v13 = vsel %vm2227_vm2, 0, %v2226_v6  ;;  %vm1539_vm2 = vcmp.eq.s32.totalorder %v1534_v57, 2 }
 0x11f   :  { %v1306_v15 = vsub.s32 4294967266, %v1301_v13  ;;  %v1204_v16 = vadd.s32 127, %v1203_v14  ;;  %v1302_v2 = vsub.s32 32, %v1301_v13  ;;  %v1201_v23 = vshrl.u32 %v1183_v12, %v1199_v11 }
 0x120   :  { %v1303_v27 = vshll.u32 %v1294_v39, %v1301_v13  ;;  %v1430_v39 = vand.u32 3, %v1429_v26  ;;  %v2607_v26 = vld [vmem:[#allocation14 + $0x8] sm:$0xff]  }
 0x121   :  { %v1307_v19 = vadd.s32 127, %v1306_v15  ;;  %v1205_v25 = vshll.u32 %v1204_v16, 23  ;;  %v1304_v28 = vshrl.u32 %v1286_v1, %v1302_v2  ;;  %v1202_v36 = vor.u32 %v1201_v23, %v1200_v29  ;;  %v1125_v2 = vld [vmem:[#allocation8 + $0x10] sm:$0xff] }
 0x122   :  { %vm1432_vm14 = vcmp.eq.s32.totalorder %v1430_v39, 0  ;;  %vm1435_vm15 = vcmp.eq.s32.totalorder %v1430_v39, 2 }
 0x123   :  { %v1308_v32 = vshll.u32 %v1307_v19, 23  ;;  %v1206_v8 = vor.u32 4788187, %v1205_v25  ;;  %v1305_v40 = vor.u32 %v1304_v28, %v1303_v27  ;;  %v1209_v43 = vcvt.s32.f32 %v1202_v36  ;;  %v1126_v19 = vld [vmem:[#allocation8 + $0x18] sm:$0xff] }
 0x125   :  { %v1309_v31 = vor.u32 4788187, %v1308_v32  ;;  %v1207_v17 = vand.u32 2147483647, %v1206_v8  ;;  %v1312_v34 = vcvt.s32.f32 %v1305_v40 }
 0x127   :  { %v1310_v24 = vand.u32 2147483647, %v1309_v31  ;;  %v1210_v42 = vmul.f32 %v1209_v43, %v1207_v17 }
 0x129   :  { %v1313_v44 = vmul.f32 %v1312_v34, %v1310_v24  ;;  %v1211_v47 = vxor.u32 2147483648, %v1210_v42 }
 0x12b   :  { %v1314_v18 = vxor.u32 2147483648, %v1313_v44  ;;  %v1212_v46 = vsel %vm1129_vm4, %v1211_v47, %v1210_v42  ;;  %vm1219_vm4 = vweird.f32 %v3172_v5 }
 0x12c   :  { %v1215_v49 = vsel %vm1128_vm6, %v3172_v5, %v1212_v46  ;;  %vm1431_vm6 = vcmp.lt.s32.totalorder %v1430_v39, 2  ;;  %v2615_v39 = vld [vmem:[#allocation16 + $0x68] sm:$0xff]  }
 0x12d   :  { %v1315_v20 = vsel %vm1232_vm5, %v1314_v18, %v1313_v44  ;;  %2642 = vcosq.f32 %v1215_v49  ;;  %vm1322_vm5 = vweird.f32 %v3174_v60 }
 0x12e   :  { %v1318_v50 = vsel %vm1231_vm7, %v3174_v60, %v1315_v20  ;;  %2644 = vsinq.f32 %v1215_v49  ;;  %vm1535_vm7 = vcmp.lt.s32.totalorder %v1534_v57, 2  ;;  %v2600_v60 = vld [vmem:[#allocation19 + $0x30] sm:$0xff]   ;;  %v2616_v57 = vld [vmem:[#allocation17 + $0x60] sm:$0xff]  }
 0x12f   :  { %2646 = vcosq.f32 %v1318_v50 }
 0x130   :  { %2648 = vsinq.f32 %v1318_v50 }
 0x13a   :  { %v2643_v9 = vpop.eup %2642 }
 0x13b   :  { %v2645_v48 = vpop.eup %2644  ;;  %v1226_v56 = vxor.u32 2147483648, %v2643_v9 }
 0x13c   :  { %v2647_v54 = vpop.eup %2646  ;;  %v1223_v59 = vxor.u32 2147483648, %v2645_v48 }
 0x13d   :  { %v2649_v55 = vpop.eup %2648  ;;  %v1329_v45 = vxor.u32 2147483648, %v2647_v54  ;;  %v1227_v61 = vsel %vm1225_vm8, %v1226_v56, %v2645_v48  ;;  %v1437_v15 = vsel %vm1435_vm15, %v1226_v56, %v2645_v48  ;;  %v2611_v56 = vld [vmem:[#allocation16 + $0x78] sm:$0xff]  }
 0x13e   :  { %v1326_v37 = vxor.u32 2147483648, %v2649_v55  ;;  %v1224_v10 = vsel %vm1222_vm9, %v2643_v9, %v1223_v59  ;;  %v1434_v14 = vsel %vm1432_vm14, %v2643_v9, %v1223_v59  ;;  %v2603_v9 = vld [vmem:[#allocation19 + $0x20] sm:$0xff]   ;;  %v2612_v59 = vld [vmem:[#allocation17 + $0x70] sm:$0xff]  }
 0x13f   :  { %v1330_v63 = vsel %vm1328_vm11, %v1329_v45, %v2649_v55  ;;  %v1228_v7 = vsel %vm1221_vm12, %v1224_v10, %v1227_v61  ;;  %v1541_v11 = vsel %vm1539_vm2, %v1329_v45, %v2649_v55  ;;  %v1438_v27 = vsel %vm1431_vm6, %v1434_v14, %v1437_v15  ;;  %v2608_v55 = vld [vmem:[#allocation19 + $0x8] sm:$0xff]   ;;  %v2618_v61 = vld [vmem:[#allocation17 + $0x58] sm:$0xff]  }
 0x140   :  { %v1327_v62 = vsel %vm1325_vm10, %v2647_v54, %v1326_v37  ;;  %v1538_v12 = vsel %vm1536_vm1, %v2647_v54, %v1326_v37  ;;  %v1229_v29 = vsel %vm1219_vm4, nan, %v1228_v7  ;;  %v1439_v17 = vsel %vm1219_vm4, nan, %v1438_v27  ;;  %v2606_v54 = vld [vmem:[#allocation19 + $0x10] sm:$0xff]   ;;  %v2614_v45 = vld [vmem:[#allocation17 + $0x68] sm:$0xff]   ;;  %v2619_v10 = vld [vmem:[#allocation16 + $0x58] sm:$0xff]  }
 0x141   :  { %v1331_v13 = vsel %vm1324_vm13, %v1327_v62, %v1330_v63  ;;  %v1542_v28 = vsel %vm1535_vm7, %v1538_v12, %v1541_v11  ;;  %v1333_v8 = vmul.f32 %v1229_v29, %v1125_v2  ;;  %v1544_v46 = vmul.f32 %v1439_v17, %v1125_v2  ;;  %v2613_v37 = vld [vmem:[#allocation16 + $0x70] sm:$0xff]  }
 0x142   :  { %v1332_v23 = vsel %vm1322_vm5, nan, %v1331_v13  ;;  %v1543_v43 = vsel %vm1322_vm5, nan, %v1542_v28  ;;  %v2620_v62 = vld [vmem:[#allocation17 + $0x50] sm:$0xff]  }
 0x143   :  { %v1334_v40 = vmul.f32 %v1332_v23, %v1126_v19  ;;  %v1545_v20 = vmul.f32 %v1543_v43, %v1126_v19  ;;  %v2621_v63 = vld [vmem:[#allocation16 + $0x50] sm:$0xff]  }
 0x145   :  { %v1335_v18 = vpack.c.bf16 %v1334_v40, %v1333_v8  ;;  %v1546_v5 = vpack.c.bf16 %v1545_v20, %v1544_v46  ;;  %v2626_v46 = vld [vmem:[#allocation19 + $0x78] sm:$0xff]  }
 0x147   :  { %v1602_v52 = vsub.bf16 %v1546_v5, %v1335_v18  ;;  %v1655_v48 = vadd.bf16 %v1546_v5, %v1335_v18 }
 0x1ac   :  { %v666_v58 = vpop.f32.mrf.mxu0 }
 0x1ae   :  { %v2353_v3 = vpop.f32.mrf.mxu0  ;;  %v718_v30 = vpop.f32.mrf.mxu1 }
 0x1af   :  { %v780_v34 = vadd.f32 %v718_v30, %v666_v58  ;;  %v2622_v3 = vld [vmem:[#allocation17 + $0x48] sm:$0xff]  }
 0x1b0   :  { %v669_v4 = vpop.f32.mrf.mxu0  ;;  %v2359_v6 = vpop.f32.mrf.mxu1  ;;  %v2623_v30 = vld [vmem:[#allocation16 + $0x48] sm:$0xff]  }
 0x1b1   :  { %v2625_v6 = vld [vmem:[#allocation16 + $0x40] sm:$0xff]  }
 0x1b2   :  { %v2354_v16 = vpop.f32.mrf.mxu0  ;;  %v721_v1 = vpop.f32.mrf.mxu1 }
 0x1b3   :  { %v781_v31 = vadd.f32 %v721_v1, %v669_v4 }
 0x1b4   :  { %v770_v25 = vpop.f32.mrf.mxu0  ;;  %v2360_v32 = vpop.f32.mrf.mxu1 }
 0x1b5   :  { %v777_v42 = vsub.f32 %v666_v58, %v770_v25  ;;  %v782_v49 = vpack.c.bf16 %v781_v31, %v780_v34  ;;  %v2617_v58 = vld [vmem:[#allocation16 + $0x60] sm:$0xff]  }
 0x1b6   :  { %v2365_v36 = vpop.f32.mrf.mxu0 }
 0x1b8   :  { %v773_v24 = vpop.f32.mrf.mxu0 }
 0x1b9   :  { %v778_v44 = vsub.f32 %v669_v4, %v773_v24  ;;  %v2624_v4 = vld [vmem:[#allocation17 + $0x40] sm:$0xff]  }
 0x1ba   :  { %v2366_v47 = vpop.f32.mrf.mxu0 }
 0x1bb   :  { %v779_v50 = vpack.c.bf16 %v778_v44, %v777_v42 }
 0x1bd   :  { %v783_v21 = vadd.bf16 %v782_v49, %v779_v50  ;;  %2404 = vmatmul.mubr.bf16.vlgmr.msra.gmra.mxu0 %v779_v50 }
 0x1be   :  { %2428 = vmatpush3.bf16.msra.mxu0 %v1335_v18  ;;  %2429 = vmatprep.mubr.msk.bf16.mxu0 %vm2912_vm0, %v2911_v0 }
 0x1bf   :  { %2384 = vmatmul.mubr.bf16.vlgmr.msra.gmra.mxu1 %v783_v21  ;;  %2433 = vmatprep.subr.bf16.mxu0 %v2911_v0  ;;  %v2627_v21 = vld [vmem:[#allocation19 + $0x70] sm:$0xff]  }
 0x1c0   :  { %2408 = vmatpush3.bf16.msra.mxu1 %v2599_v33  ;;  %2423 = vmatprep.mubr.msk.bf16.mxu1 %vm2912_vm0, %v2911_v0 }
 0x1c1   :  { %2409 = vmatprep.subr.bf16.mxu1 %v2911_v0 }
 0x1c4   :  { %2410 = vmatpush3.bf16.msra.mxu1 %v2600_v60 }
 0x1c5   :  { %2430 = vmatmul.mubr.msk.bf16.vlgmr.msra.gmra.mxu0 %vm628_vm3, %v2601_v51  ;;  %2411 = vmatprep.subr.bf16.mxu1 %v2911_v0 }
 0x1c6   :  { %2434 = vmatpush3.bf16.msra.mxu0 %v1602_v52  ;;  %2435 = vmatprep.mubr.msk.bf16.mxu0 %vm2912_vm0, %v2911_v0 }
 0x1c7   :  { %2439 = vmatprep.subr.bf16.mxu0 %v2911_v0 }
 0x1c8   :  { %2412 = vmatpush3.bf16.msra.mxu1 %v2602_v41 }
 0x1c9   :  { %2413 = vmatprep.subr.bf16.mxu1 %v2911_v0 }
 0x1cc   :  { %2414 = vmatpush3.bf16.msra.mxu1 %v2603_v9 }
 0x1cd   :  { %2436 = vmatmul.mubr.msk.bf16.vlgmr.msra.gmra.mxu0 %vm628_vm3, %v2604_v22  ;;  %2415 = vmatprep.subr.bf16.mxu1 %v2911_v0  ;;  %v2628_v22 = vld [vmem:[#allocation19 + $0x68] sm:$0xff]  }
 0x1ce   :  { %2440 = vmatpush3.bf16.msra.mxu0 %v1655_v48  ;;  %2441 = vmatprep.mubr.msk.bf16.mxu0 %vm2912_vm0, %v2911_v0 }
 0x1cf   :  { %2445 = vmatprep.subr.bf16.mxu0 %v2911_v0 }
 0x1d0   :  { %2416 = vmatpush3.bf16.msra.mxu1 %v2605_v53 }
 0x1d1   :  { %2417 = vmatprep.subr.bf16.mxu1 %v2911_v0 }
 0x1d4   :  { %2418 = vmatpush3.bf16.msra.mxu1 %v2606_v54 }
 0x1d5   :  { %2442 = vmatmul.mubr.msk.bf16.vlgmr.msra.gmra.mxu0 %vm628_vm3, %v2607_v26  ;;  %2419 = vmatprep.subr.bf16.mxu1 %v2911_v0  ;;  %v2629_v26 = vld [vmem:[#allocation19 + $0x60] sm:$0xff]  }
 0x1d6   :  { %2461 = vmatprep.mubr.msk.bf16.mxu0 %vm2912_vm0, %v2911_v0  ;;  %2446 = vmatpush3.bf16.msra.mxu0 %v2611_v56  ;;  %v2633_v56 = vld [vmem:[#allocation19 + $0x40] sm:$0xff]  }
 0x1d7   :  { %2447 = vmatprep.subr.bf16.mxu0 %v2911_v0 }
 0x1d8   :  { %2420 = vmatpush3.bf16.msra.mxu1 %v2608_v55  ;;  %v2630_v55 = vld [vmem:[#allocation19 + $0x58] sm:$0xff]  }
 0x1d9   :  { %2421 = vmatprep.subr.bf16.mxu1 %v2911_v0 }
 0x1da   :  { %2448 = vmatpush3.bf16.msra.mxu0 %v2613_v37  ;;  %v2069_v37 = vld [vmem:[#allocation20 + $0x70] sm:$0xff] }
 0x1db   :  { %2449 = vmatprep.subr.bf16.mxu0 %v2911_v0 }
 0x1dc   :  { %2422 = vmatpush3.bf16.msra.mxu1 %v2609_v38  ;;  %v2631_v38 = vld [vmem:[#allocation19 + $0x50] sm:$0xff]  }
 0x1dd   :  { %2465 = vmatprep.subr.bf16.mxu1 %v2911_v0 }
 0x1de   :  { %2450 = vmatpush3.bf16.msra.mxu0 %v2615_v39  ;;  %v2067_v39 = vld [vmem:[#allocation20 + $0x60] sm:$0xff] }
 0x1df   :  { %2424 = vmatmul.mubr.bf16.vlgmr.msra.gmra.mxu1 %v782_v49  ;;  %2451 = vmatprep.subr.bf16.mxu0 %v2911_v0 }
 0x1e0   :  { %2481 = vmatprep.mubr.msk.bf16.mxu1 %vm2912_vm0, %v2911_v0  ;;  %2466 = vmatpush3.bf16.msra.mxu1 %v2610_v35  ;;  %v2632_v35 = vld [vmem:[#allocation19 + $0x48] sm:$0xff]  }
 0x1e1   :  { %2467 = vmatprep.subr.bf16.mxu1 %v2911_v0 }
 0x1e2   :  { %2452 = vmatpush3.bf16.msra.mxu0 %v2617_v58  ;;  %v2065_v58 = vld [vmem:[#allocation20 + $0x50] sm:$0xff] }
 0x1e3   :  { %2453 = vmatprep.subr.bf16.mxu0 %v2911_v0 }
 0x1e4   :  { %2468 = vmatpush3.bf16.msra.mxu1 %v2612_v59  ;;  %v2070_v59 = vld [vmem:[#allocation20 + $0x78] sm:$0xff] }
 0x1e5   :  { %2469 = vmatprep.subr.bf16.mxu1 %v2911_v0 }
 0x1e6   :  { %2454 = vmatpush3.bf16.msra.mxu0 %v2619_v10  ;;  %v2063_v10 = vld [vmem:[#allocation20 + $0x40] sm:$0xff] }
 0x1e7   :  { %2455 = vmatprep.subr.bf16.mxu0 %v2911_v0 }
 0x1e8   :  { %2470 = vmatpush3.bf16.msra.mxu1 %v2614_v45  ;;  %v2068_v45 = vld [vmem:[#allocation20 + $0x68] sm:$0xff] }
 0x1e9   :  { %2471 = vmatprep.subr.bf16.mxu1 %v2911_v0 }
 0x1ea   :  { %2456 = vmatpush3.bf16.msra.mxu0 %v2621_v63  ;;  %v2061_v63 = vld [vmem:[#allocation20 + $0x30] sm:$0xff] }
 0x1eb   :  { %2457 = vmatprep.subr.bf16.mxu0 %v2911_v0 }
 0x1ec   :  { %2472 = vmatpush3.bf16.msra.mxu1 %v2616_v57  ;;  %v2066_v57 = vld [vmem:[#allocation20 + $0x58] sm:$0xff] }
 0x1ed   :  { %2473 = vmatprep.subr.bf16.mxu1 %v2911_v0 }
 0x1ee   :  { %2458 = vmatpush3.bf16.msra.mxu0 %v2623_v30  ;;  %v2059_v30 = vld [vmem:[#allocation20 + $0x20] sm:$0xff] }
 0x1ef   :  { %2459 = vmatprep.subr.bf16.mxu0 %v2911_v0 }
 0x1f0   :  { %2474 = vmatpush3.bf16.msra.mxu1 %v2618_v61  ;;  %v2064_v61 = vld [vmem:[#allocation20 + $0x48] sm:$0xff] }
 0x1f1   :  { %2475 = vmatprep.subr.bf16.mxu1 %v2911_v0 }
 0x1f2   :  { %2460 = vmatpush3.bf16.msra.mxu0 %v2625_v6  ;;  %v2057_v6 = vld [vmem:[#allocation20 + $0x10] sm:$0xff] }
 0x1f3   :  { %2485 = vmatprep.subr.bf16.mxu0 %v2911_v0 }
 0x1f4   :  { %2476 = vmatpush3.bf16.msra.mxu1 %v2620_v62  ;;  %v2062_v62 = vld [vmem:[#allocation20 + $0x38] sm:$0xff] }
 0x1f5   :  { %2477 = vmatprep.subr.bf16.mxu1 %v2911_v0 }
 0x1f8   :  { %2478 = vmatpush3.bf16.msra.mxu1 %v2622_v3  ;;  %v2060_v3 = vld [vmem:[#allocation20 + $0x28] sm:$0xff] }
 0x1f9   :  { %2479 = vmatprep.subr.bf16.mxu1 %v2911_v0 }
 0x1fc   :  { %2480 = vmatpush3.bf16.msra.mxu1 %v2624_v4  ;;  %v2058_v4 = vld [vmem:[#allocation20 + $0x18] sm:$0xff] }
 0x1fd   :  { %2505 = vmatprep.subr.mxu1 %v2911_v0 }
 0x27d   :  { %v987_v7 = vpop.f32.mrf.mxu0 }
 0x27f   :  { %v882_v13 = vpop.f32.mrf.mxu1  ;;  %v2405_v14 = vpop.f32.mrf.mxu0 }
 0x280   :  { %v1101_v15 = vadd.f32 %v987_v7, %v882_v13  ;;  %v2056_v7 = vld [vmem:[#allocation20 + $0x8] sm:$0xff] }
 0x281   :  { %v2385_v12 = vpop.f32.mrf.mxu1  ;;  %v990_v11 = vpop.f32.mrf.mxu0 }
 0x282   :  { %v1107_v5 = vmul.f32 %v1101_v15, %v1101_v15 }
 0x283   :  { %v885_v16 = vpop.f32.mrf.mxu1  ;;  %v2406_v1 = vpop.f32.mrf.mxu0 }
 0x284   :  { %v1102_v2 = vadd.f32 %v990_v11, %v885_v16 }
 0x285   :  { %v2386_v19 = vpop.f32.mrf.mxu1  ;;  %v1592_v29 = vpop.f32.mrf.mxu0 }
 0x286   :  { %v1108_v48 = vmul.f32 %v1102_v2, %v1102_v2 }
 0x287   :  { %v2431_v23 = vpop.f32.mrf.mxu0 }
 0x289   :  { %v1595_v25 = vpop.f32.mrf.mxu0 }
 0x28b   :  { %v2432_v27 = vpop.f32.mrf.mxu0 }
 0x28d   :  { %v1645_v28 = vpop.f32.mrf.mxu0 }
 0x28e   :  { %v1708_v24 = vadd.f32 %v1645_v28, %v1592_v29 }
 0x28f   :  { %v2437_v32 = vpop.f32.mrf.mxu0 }
 0x291   :  { %v1648_v36 = vpop.f32.mrf.mxu0 }
 0x292   :  { %v1709_v17 = vadd.f32 %v1648_v36, %v1595_v25 }
 0x293   :  { %v2438_v8 = vpop.f32.mrf.mxu0 }
 0x294   :  { %v1710_v47 = vpack.c.bf16 %v1709_v17, %v1708_v24 }
 0x295   :  { %v1698_v40 = vpop.f32.mrf.mxu0 }
 0x296   :  { %v1705_v34 = vsub.f32 %v1592_v29, %v1698_v40 }
 0x297   :  { %v2443_v31 = vpop.f32.mrf.mxu0 }
 0x299   :  { %v1701_v43 = vpop.f32.mrf.mxu0 }
 0x29a   :  { %v1706_v42 = vsub.f32 %v1595_v25, %v1701_v43 }
 0x29b   :  { %v2444_v44 = vpop.f32.mrf.mxu0 }
 0x29c   :  { %v1707_v18 = vpack.c.bf16 %v1706_v42, %v1705_v34 }
 0x29e   :  { %v1711_v20 = vadd.bf16 %v1710_v47, %v1707_v18  ;;  %2482 = vmatmul.mubr.bf16.vlgmr.msra.gmra.mxu1 %v1707_v18 }
 0x29f   :  { %v1092_v49 = vpop.f32.mrf.mxu1  ;;  %2537 = vmatprep.mubr.msk.f32.mxu1 %vm2912_vm0, %v2911_v0  ;;  %2506 = vmatpush3.msra.mxu1 %v2070_v59 }
 0x2a0   :  { %v1099_v50 = vsub.f32 %v882_v13, %v1092_v49  ;;  %2462 = vmatmul.mubr.bf16.vlgmr.msra.gmra.mxu0 %v1711_v20  ;;  %2507 = vmatprep.subr.mxu1 %v2911_v0  ;;  %v2055_v13 = vld [vmem:[#allocation20] sm:$0xff] }
 0x2a1   :  { %v2425_v33 = vpop.f32.mrf.mxu1  ;;  %2486 = vmatpush3.bf16.msra.mxu0 %v2626_v46  ;;  %2501 = vmatprep.mubr.msk.bf16.mxu0 %vm2912_vm0, %v2911_v0 }
 0x2a2   :  { %v1105_v60 = vmul.f32 %v1099_v50, %v1099_v50  ;;  %2487 = vmatprep.subr.bf16.mxu0 %v2911_v0  ;;  %2508 = vmatpush3.msra.mxu1 %v2069_v37 }
 0x2a3   :  { %v1095_v51 = vpop.f32.mrf.mxu1  ;;  %2509 = vmatprep.subr.mxu1 %v2911_v0 }
 0x2a4   :  { %v3385_v52 = vadd.f32 %v1107_v5, %v1105_v60  ;;  %v1100_v41 = vsub.f32 %v885_v16, %v1095_v51  ;;  %2510 = vmatpush3.msra.mxu1 %v2068_v45  ;;  %v2142_v5 = vlaneseq }
 0x2a5   :  { %v2426_v9 = vpop.f32.mrf.mxu1  ;;  %2488 = vmatpush3.bf16.msra.mxu0 %v2627_v21  ;;  %2511 = vmatprep.subr.mxu1 %v2911_v0 }
 0x2a6   :  { %v1106_v53 = vmul.f32 %v1100_v41, %v1100_v41  ;;  %2489 = vmatprep.subr.bf16.mxu0 %v2911_v0  ;;  %2512 = vmatpush3.msra.mxu1 %v2067_v39  ;;  %v2143_v60 = vshrl.u32 %v2142_v5, 7 }
 0x2a7   :  { %2513 = vmatprep.subr.mxu1 %v2911_v0 }
 0x2a8   :  { %v3388_v54 = vadd.f32 %v1108_v48, %v1106_v53  ;;  %2514 = vmatpush3.msra.mxu1 %v2066_v57  ;;  %v2144_v51 = vsub.s32 0, %v2143_v60 }
 0x2a9   :  { %2490 = vmatpush3.bf16.msra.mxu0 %v2628_v22  ;;  %2515 = vmatprep.subr.mxu1 %v2911_v0 }
 0x2aa   :  { %2491 = vmatprep.subr.bf16.mxu0 %v2911_v0  ;;  %2516 = vmatpush3.msra.mxu1 %v2065_v58 }
 0x2ab   :  { %2517 = vmatprep.subr.mxu1 %v2911_v0 }
 0x2ac   :  { %2518 = vmatpush3.msra.mxu1 %v2064_v61 }
 0x2ad   :  { %2492 = vmatpush3.bf16.msra.mxu0 %v2629_v26  ;;  %2519 = vmatprep.subr.mxu1 %v2911_v0 }
 0x2ae   :  { %2493 = vmatprep.subr.bf16.mxu0 %v2911_v0  ;;  %2520 = vmatpush3.msra.mxu1 %v2063_v10 }
 0x2af   :  { %2521 = vmatprep.subr.mxu1 %v2911_v0 }
 0x2b0   :  { %2522 = vmatpush3.msra.mxu1 %v2062_v62 }
 0x2b1   :  { %2494 = vmatpush3.bf16.msra.mxu0 %v2630_v55  ;;  %2523 = vmatprep.subr.mxu1 %v2911_v0 }
 0x2b2   :  { %2495 = vmatprep.subr.bf16.mxu0 %v2911_v0  ;;  %2524 = vmatpush3.msra.mxu1 %v2061_v63 }
 0x2b3   :  { %2525 = vmatprep.subr.mxu1 %v2911_v0 }
 0x2b4   :  { %2526 = vmatpush3.msra.mxu1 %v2060_v3 }
 0x2b5   :  { %2496 = vmatpush3.bf16.msra.mxu0 %v2631_v38  ;;  %2527 = vmatprep.subr.mxu1 %v2911_v0 }
 0x2b6   :  { %2497 = vmatprep.subr.bf16.mxu0 %v2911_v0  ;;  %2528 = vmatpush3.msra.mxu1 %v2059_v30 }
 0x2b7   :  { %2529 = vmatprep.subr.mxu1 %v2911_v0 }
 0x2b8   :  { %2530 = vmatpush3.msra.mxu1 %v2058_v4 }
 0x2b9   :  { %2498 = vmatpush3.bf16.msra.mxu0 %v2632_v35  ;;  %2531 = vmatprep.subr.mxu1 %v2911_v0 }
 0x2ba   :  { %2499 = vmatprep.subr.bf16.mxu0 %v2911_v0  ;;  %2532 = vmatpush3.msra.mxu1 %v2057_v6 }
 0x2bb   :  { %2533 = vmatprep.subr.mxu1 %v2911_v0 }
 0x2bc   :  { %2534 = vmatpush3.msra.mxu1 %v2056_v7 }
 0x2bd   :  { %2500 = vmatpush3.bf16.msra.mxu0 %v2633_v56  ;;  %2535 = vmatprep.subr.mxu1 %v2911_v0 }
 0x2be   :  { %2536 = vmatpush3.msra.mxu1 %v2055_v13 }
 0x2c0   :  { %2502 = vmatmul.mubr.bf16.vlgmr.msra.gmra.mxu0 %v1710_v47 }
 0x35e   :  { %v1917_v14 = vpop.f32.mrf.mxu1 }
 0x360   :  { %v1811_v15 = vpop.f32.mrf.mxu0  ;;  %v2483_v12 = vpop.f32.mrf.mxu1 }
 0x361   :  { %v2032_v23 = vadd.f32 %v1917_v14, %v1811_v15 }
 0x362   :  { %v2463_v11 = vpop.f32.mrf.mxu0  ;;  %v1920_v16 = vpop.f32.mrf.mxu1 }
 0x363   :  { %v2038_v8 = vmul.f32 %v2032_v23, %v2032_v23 }
 0x364   :  { %v1814_v1 = vpop.f32.mrf.mxu0  ;;  %v2484_v2 = vpop.f32.mrf.mxu1 }
 0x365   :  { %v2033_v28 = vadd.f32 %v1920_v16, %v1814_v1 }
 0x366   :  { %v2464_v19 = vpop.f32.mrf.mxu0 }
 0x367   :  { %v2039_v0 = vmul.f32 %v2033_v28, %v2033_v28 }
 0x380   :  { %v2023_v29 = vpop.f32.mrf.mxu0 }
 0x381   :  { %v2030_v25 = vsub.f32 %v1811_v15, %v2023_v29 }
 0x382   :  { %v2503_v27 = vpop.f32.mrf.mxu0 }
 0x383   :  { %v2036_v32 = vmul.f32 %v2030_v25, %v2030_v25 }
 0x384   :  { %v2026_v36 = vpop.f32.mrf.mxu0 }
 0x385   :  { %v2031_v40 = vsub.f32 %v1814_v1, %v2026_v36  ;;  %v2040_v17 = vadd.f32 %v2038_v8, %v2036_v32 }
 0x386   :  { %v2504_v31 = vpop.f32.mrf.mxu0 }
 0x387   :  { %v2037_v43 = vmul.f32 %v2031_v40, %v2031_v40  ;;  %v2042_v34 = vadd.f32 %v2040_v17, %v3385_v52 }
 0x389   :  { %v2041_v24 = vadd.f32 %v2039_v0, %v2037_v43 }
 0x38b   :  { %v2043_v42 = vadd.f32 %v2041_v24, %v3388_v54 }
 0x38d   :  { %v2048_v44 = vadd.f32 %v2043_v42, %v2042_v34 }
 0x38f   :  { %v2049_v47 = vrot.slane %v2048_v44, 4 }
 0x391   :  { %v2050_v18 = vadd.f32 %v2049_v47, %v2048_v44 }
 0x393   :  { %v2051_v46 = vrot.slane %v2050_v18, 2 }
 0x395   :  { %v2052_v20 = vadd.f32 %v2051_v46, %v2050_v18 }
 0x397   :  { %v2053_v49 = vrot.slane %v2052_v20, 1 }
 0x399   :  { %v2054_v50 = vadd.f32 %v2053_v49, %v2052_v20 }
 0x39b   :  { %2538 = vmatmul.mubr.f32.vlgmr.msra.gmra.mxu1 %v2054_v50 }
 0x45b   :  { %v2137_v33 = vpop.f32.mrf.mxu1 }
 0x45c   :  { %2650 = vrcp.f32 %v2137_v33 }
 0x45d   :  { %v2539_v21 = vpop.f32.mrf.mxu1 }
 0x469   :  { %v2651_v41 = vpop.eup %2650 }
 0x46a   :  { %v2145_v52 = vrot.slane %v2651_v41, %v2144_v51 }
 0x46c   :  { %v2146_v9 = vmul.f32 %v2145_v52, %v2042_v34  ;;  %v2147_v22 = vmul.f32 %v2145_v52, %v2043_v42 }
 0x46e   :  { %2148 = vst [vmem:[#allocation22] sm:$0xff] %v2146_v9  ;;  %2149 = vst [vmem:[#allocation22 + $0x8] sm:$0xff] %v2147_v22 }
 0x46f   :  { %2871 = shalt.err (!%p2868_p12)
}
 0x470   :  { %2161 = dma.vmem_to_hbm [thread:$0]  %s2156_s28, 256, %s3429_s11, [#allocation5], %s2898_s22, %s2898_s22, %s2899_s23  }
 0x471   :  { %2894 = dma.done.wait [#allocation5], 256  }
 0x472   :  { %2895 = vsyncadd [#allocation5], 4294967040 }
 0x473   :  { %2165 = vsyncpa [#allocation4], 1 }
 0x474   :  { %2166 = vsyncpa [#allocation9], 1 }
 0x475   :  { %2167 = vsyncpa [#allocation12], 1 }
 0x476   :  { %2168 = vsyncpa [#allocation15], 1 }
 0x477   :  { %2169 = vsyncpa [#allocation18], 1 }
 0x478   :  { %2170 = vsyncpa [#allocation21], 1 }
 0x479   :  { %2171 = vsyncpa [#allocation5], 1 }
 0x47a   :  { %2172 = vsyncpa [#allocation6], 1 }

</bundles_post_ra>
